<compile_context>
chip_gen: v5e
topology: v5e:2x2
jax: 0.10.0
libtpu: 0.0.40
codegen_flags: <defaults>
</compile_context>

<pallas_src>
import numpy as np
import jax
import jax.numpy as jnp
from jax.experimental import pallas as pl
from jax.experimental.pallas import tpu as pltpu
import functools


# -----------------------------------------------------------------------------
# Fused kernel: embed + depth x GRU + (Linear, ReLU, Linear) head + masked CE
# -----------------------------------------------------------------------------
def make_fused_kernel(depth, T, B, H, V, mxu_dtype):
    TB = T * B

    def kernel(*refs):
        # ---- unpack refs: inputs..., outputs -------------------------------
        tgt_ref, tgt_shift_ref, mask_ref, lat_ref, wemb_ref = refs[0:5]
        gru_refs = [refs[5 + 4 * l: 9 + 4 * l] for l in range(depth)]
        base = 5 + 4 * depth
        w1_ref, b1_ref, w2_ref, b2_ref = refs[base:base + 4]
        preds_ref, loss_ref = refs[base + 4], refs[base + 5]

        f32 = jnp.float32

        # ---- one-hots built in-kernel from integer ids, in the MXU dtype ----
        iota_v = jax.lax.broadcasted_iota(jnp.int32, (TB, V), 1)
        oh_shift = (tgt_shift_ref[...] == iota_v).astype(mxu_dtype)   # (TB, V)

        # ---- embedding + latent (latent broadcast in-kernel) ----------------
        emb = jnp.dot(oh_shift, wemb_ref[...],
                      preferred_element_type=f32)                     # (TB, L)
        lat = lat_ref[...]                                            # (B, L)
        x0 = emb + jnp.concatenate([lat] * T, axis=0)                 # (TB, L)

        # ---- load all GRU weights once (values stay resident) ---------------
        layer_w = []
        for l in range(depth):
            wih_ref, whh_ref, bih_ref, bhh_ref = gru_refs[l]
            layer_w.append((wih_ref[...], whh_ref[...],
                            bih_ref[...], bhh_ref[...]))

        # ---- batched input-gate matmul for layer 0 over all T*B rows --------
        wih0, whh0, bih0, bhh0 = layer_w[0]
        gi0 = jnp.dot(x0.astype(mxu_dtype), wih0,
                      preferred_element_type=f32) + bih0              # (TB, 3H)

        # ---- fused GRU cell (PyTorch gate order r, z, n) ---------------------
        def gru_cell(gi, h, w_hh, b_hh):
            gh = jnp.dot(h.astype(mxu_dtype), w_hh,
                         preferred_element_type=f32) + b_hh           # (B, 3H)
            r = jax.nn.sigmoid(gi[:, 0:H] + gh[:, 0:H])
            z = jax.nn.sigmoid(gi[:, H:2 * H] + gh[:, H:2 * H])
            n = jnp.tanh(gi[:, 2 * H:3 * H] + r * gh[:, 2 * H:3 * H])
            return (1.0 - z) * n + z * h

        # ---- single time loop advancing every layer (wavefront) -------------
        h = [jnp.zeros((B, H), f32) for _ in range(depth)]
        outs = []
        for t in range(T):                         # fully unrolled, static
            lo, hi = t * B, (t + 1) * B
            h[0] = gru_cell(gi0[lo:hi], h[0], whh0, bhh0)
            for l in range(1, depth):
                wih_l, whh_l, bih_l, bhh_l = layer_w[l]
                gi_l = jnp.dot(h[l - 1].astype(mxu_dtype), wih_l,
                               preferred_element_type=f32) + bih_l
                h[l] = gru_cell(gi_l, h[l], whh_l, bhh_l)
            outs.append(h[depth - 1])
        x = jnp.concatenate(outs, axis=0)          # (TB, H), never hits VMEM scratch

        # ---- output head: Linear -> ReLU -> Linear (batched over T*B) -------
        z1 = jnp.maximum(
            jnp.dot(x.astype(mxu_dtype), w1_ref[...],
                    preferred_element_type=f32) + b1_ref[...], 0.0)
        logits = jnp.dot(z1.astype(mxu_dtype), w2_ref[...],
                         preferred_element_type=f32) + b2_ref[...]    # (TB, V)

        # ---- argmax over vocab (first occurrence) ----------------------------
        m = jnp.max(logits, axis=-1, keepdims=True)                   # (TB, 1)
        cand = jnp.where(logits == m, iota_v, V)
        preds_ref[...] = jnp.min(cand, axis=-1, keepdims=True).astype(jnp.int32)

        # ---- masked mean cross-entropy, reduced fully in-kernel --------------
        lse = m + jnp.log(jnp.sum(jnp.exp(logits - m), axis=-1, keepdims=True))
        tgt_logit = jnp.sum(jnp.where(tgt_ref[...] == iota_v, logits, 0.0),
                            axis=-1, keepdims=True)
        losses = lse - tgt_logit                                      # (TB, 1)
        mask = mask_ref[...]
        loss_sum = jnp.sum(losses * mask, axis=0, keepdims=True)      # (1, 1)
        mask_sum = jnp.sum(mask, axis=0, keepdims=True)               # (1, 1)
        loss_ref[...] = loss_sum / mask_sum       # NOTE: same div-by-0 behavior
                                                  # as the PyTorch reference.
    return kernel


# -----------------------------------------------------------------------------
# One-time parameter preparation: transpose once, fuse gates, cast MXU operands
# -----------------------------------------------------------------------------
def prepare_params(params, depth, hidden, mxu_dtype=jnp.bfloat16):
    prep = {
        "w_embed_t": jnp.transpose(params["w_embed"]).astype(mxu_dtype),  # (V, L)
        "w1_t": jnp.transpose(params["w1"]).astype(mxu_dtype),            # (H, H)
        "b1": params["b1"].astype(jnp.float32),                           # (1, H)
        "w2_t": jnp.transpose(params["w2"]).astype(mxu_dtype),            # (H, V)
        "b2": params["b2"].astype(jnp.float32),                           # (1, V)
        "gru": [],
    }
    for l in range(depth):
        p = params["gru"][l]
        prep["gru"].append({
            # fused gate layout: columns ordered [r | z | n], 3H <= 128 lanes
            "w_ih_t": jnp.transpose(p["w_ih"]).astype(mxu_dtype),   # (Din, 3H)
            "w_hh_t": jnp.transpose(p["w_hh"]).astype(mxu_dtype),   # (H, 3H)
            "b_ih": p["b_ih"].astype(jnp.float32),                  # (1, 3H)
            "b_hh": p["b_hh"].astype(jnp.float32),                  # (1, 3H)
        })
    return prep


# -----------------------------------------------------------------------------
# Full forward (matches RNNDecoder.forward up to string decoding)
# -----------------------------------------------------------------------------
def rnn_decoder_forward(prep, latent, targets, mask, *, depth, hidden,
                        latent_dim, vocab_size):
    B, T = targets.shape
    H, V = hidden, vocab_size
    TB = T * B
    mxu_dtype = prep["w1_t"].dtype

    tgt_tb = jnp.transpose(targets.astype(jnp.int32))                 # (T, B)
    tgt_flat = tgt_tb.reshape(TB, 1)
    # shifted targets; sentinel -1 => all-zero one-hot row at t = 0
    tgt_shift_flat = jnp.concatenate(
        [jnp.full((1, B), -1, jnp.int32), tgt_tb[:-1]], axis=0).reshape(TB, 1)
    mask_flat = jnp.transpose(mask.astype(jnp.float32)).reshape(TB, 1)
    lat = latent.astype(jnp.float32)                                  # (B, L)

    args = [tgt_flat, tgt_shift_flat, mask_flat, lat, prep["w_embed_t"]]
    for l in range(depth):
        g = prep["gru"][l]
        args += [g["w_ih_t"], g["w_hh_t"], g["b_ih"], g["b_hh"]]
    args += [prep["w1_t"], prep["b1"], prep["w2_t"], prep["b2"]]

    kernel = make_fused_kernel(depth, T, B, H, V, mxu_dtype)
    preds_flat, loss = pl.pallas_call(
        kernel,
        out_shape=(jax.ShapeDtypeStruct((TB, 1), jnp.int32),
                   jax.ShapeDtypeStruct((1, 1), jnp.float32)),
        in_specs=[pl.BlockSpec(memory_space=pltpu.MemorySpace.VMEM)
                  for _ in range(len(args))],
        out_specs=(pl.BlockSpec(memory_space=pltpu.MemorySpace.VMEM),
                   pl.BlockSpec(memory_space=pltpu.MemorySpace.VMEM)),
    )(*args)

    avg_loss = loss[0, 0]
    preds = jnp.transpose(preds_flat.reshape(T, B))                    # (B, T)
    return avg_loss, preds


# -----------------------------------------------------------------------------
# Pure-JAX reference (raw PyTorch-layout params, f32)
# -----------------------------------------------------------------------------
def gru_layer_ref(x, w_ih, w_hh, b_ih, b_hh):
    H = w_hh.shape[1]

    def step(h, x_t):
        gi = x_t @ w_ih.T + b_ih[0]
        gh = h @ w_hh.T + b_hh[0]
        r = jax.nn.sigmoid(gi[:, :H] + gh[:, :H])
        z = jax.nn.sigmoid(gi[:, H:2 * H] + gh[:, H:2 * H])
        n = jnp.tanh(gi[:, 2 * H:] + r * gh[:, 2 * H:])
        h_new = (1.0 - z) * n + z * h
        return h_new, h_new

    h0 = jnp.zeros((x.shape[1], H), jnp.float32)
    _, ys = jax.lax.scan(step, h0, x)
    return ys


def rnn_decoder_ref(params, latent, targets, mask, *, depth, hidden, vocab_size):
    B, T = targets.shape
    V = vocab_size
    onehot_btv = jax.nn.one_hot(targets, V, dtype=jnp.float32)
    onehot_tbv = jnp.transpose(onehot_btv, (1, 0, 2))
    onehot_shift = jnp.concatenate(
        [jnp.zeros((1, B, V), jnp.float32), onehot_tbv[:-1]], axis=0)
    x = latent[None] + jnp.einsum("tbv,lv->tbl", onehot_shift, params["w_embed"])
    for l in range(depth):
        p = params["gru"][l]
        x = gru_layer_ref(x, p["w_ih"], p["w_hh"], p["b_ih"], p["b_hh"])
    z1 = jnp.maximum(jnp.einsum("tbh,oh->tbo", x, params["w1"]) + params["b1"][0], 0.0)
    logits = jnp.einsum("tbh,vh->tbv", z1, params["w2"]) + params["b2"][0]
    logp = jax.nn.log_softmax(logits, axis=-1)
    losses = -jnp.sum(onehot_tbv * logp, axis=-1).T                    # (B, T)
    avg_loss = jnp.sum(losses * mask) / jnp.sum(mask)
    preds = jnp.argmax(jnp.transpose(logits, (1, 0, 2)), axis=-1)
    return avg_loss, preds


# -----------------------------------------------------------------------------
# Deterministic parameter init (PyTorch-like uniform ranges, PyTorch layout)
# -----------------------------------------------------------------------------
def init_params(key, vocab_size, latent_dim, hidden_dim, depth):
    def u(k, shape, bound):
        return jax.random.uniform(k, shape, jnp.float32, -bound, bound)

    keys = jax.random.split(key, 5 + 4 * depth)
    kH = 1.0 / np.sqrt(hidden_dim)
    kV = 1.0 / np.sqrt(vocab_size)
    params = {
        "w_embed": u(keys[0], (latent_dim, vocab_size), kV),   # fc_embed.weight
        "w1": u(keys[1], (hidden_dim, hidden_dim), kH),
        "b1": u(keys[2], (1, hidden_dim), kH),
        "w2": u(keys[3], (vocab_size, hidden_dim), kH),
        "b2": u(keys[4], (1, vocab_size), kH),
        "gru": [],
    }
    for l in range(depth):
        din = latent_dim if l == 0 else hidden_dim
        k0, k1, k2, k3 = keys[5 + 4 * l: 9 + 4 * l]
        params["gru"].append({
            "w_ih": u(k0, (3 * hidden_dim, din), kH),
            "w_hh": u(k1, (3 * hidden_dim, hidden_dim), kH),
            "b_ih": u(k2, (1, 3 * hidden_dim), kH),
            "b_hh": u(k3, (1, 3 * hidden_dim), kH),
        })
    return params


# -----------------------------------------------------------------------------
# String decoding (host-side glue, mirrors decode_single / decode_outputs)
# -----------------------------------------------------------------------------
def decode_outputs(pred_indices, vocab):
    vocab_map = {v: k for k, v in vocab.items()}
    stop = vocab["[nop]"]
    seqs = []
    for row in np.asarray(pred_indices):
        s = ""
        for idx in row:
            if int(idx) == stop:
                break
            s += vocab_map[int(idx)]
        seqs.append(s)
    return seqs


if __name__ == "__main__":
    vocab = {"C": 0, "N": 1, "O": 2, "F": 3, "(": 4, ")": 5, "=": 6,
             "1": 7, "2": 8, "#": 9, "c": 10, "[nop]": 11}
    V = len(vocab)
    B, T = 2, 8
    HIDDEN, LATENT, DEPTH = 32, 16, 2

    key = jax.random.PRNGKey(0)
    k_param, k_lat, k_tgt = jax.random.split(key, 3)
    params = init_params(k_param, V, LATENT, HIDDEN, DEPTH)

    latent_vectors = jax.random.normal(k_lat, (B, LATENT), jnp.float32)
    sequence_targets = jax.random.randint(k_tgt, (B, T), 0, V).astype(jnp.int32)
    mask_targets = jnp.ones((B, T), jnp.float32)

    fwd = jax.jit(functools.partial(
        rnn_decoder_forward, depth=DEPTH, hidden=HIDDEN,
        latent_dim=LATENT, vocab_size=V))

    # High-precision pure-JAX reference.
    with jax.default_matmul_precision("highest"):
        ref_loss, ref_preds = rnn_decoder_ref(
            params, latent_vectors, sequence_targets, mask_targets,
            depth=DEPTH, hidden=HIDDEN, vocab_size=V)
    ref_loss = jax.block_until_ready(ref_loss)

    # 1) f32-weight variant of the kernel: tight correctness validation.
    prep_f32 = prepare_params(params, DEPTH, HIDDEN, mxu_dtype=jnp.float32)
    loss_f32, preds_f32 = fwd(prep_f32, latent_vectors, sequence_targets,
                              mask_targets)
    loss_f32 = jax.block_until_ready(loss_f32)
    assert abs(float(loss_f32) - float(ref_loss)) < 5e-3, (
        f"f32 loss mismatch: {float(loss_f32)} vs {float(ref_loss)}")

    # 2) bf16 MXU-operand variant (the performance configuration).
    prep_bf16 = prepare_params(params, DEPTH, HIDDEN, mxu_dtype=jnp.bfloat16)
    avg_loss, preds = fwd(prep_bf16, latent_vectors, sequence_targets,
                          mask_targets)
    avg_loss = jax.block_until_ready(avg_loss)
    preds = jax.device_get(preds)

    assert preds.shape == (B, T)
    assert int(np.min(preds)) >= 0 and int(np.max(preds)) < V
    assert abs(float(avg_loss) - float(ref_loss)) < 5e-2, (
        f"bf16 loss mismatch: {float(avg_loss)} vs {float(ref_loss)}")

    decoded_sequences = decode_outputs(preds, vocab)
    assert len(decoded_sequences) == B
    print("KERNEL_OK")
</pallas_src>

<mosaic_0001>
module attributes {stable_mosaic.version = 11 : i64} {
  func.func @kernel(%arg0: memref<16x1xi32, #tpu.memory_space<vmem>>, %arg1: memref<16x1xi32, #tpu.memory_space<vmem>>, %arg2: memref<16x1xf32, #tpu.memory_space<vmem>>, %arg3: memref<2x16xf32, #tpu.memory_space<vmem>>, %arg4: memref<12x16xf32, #tpu.memory_space<vmem>>, %arg5: memref<16x96xf32, #tpu.memory_space<vmem>>, %arg6: memref<32x96xf32, #tpu.memory_space<vmem>>, %arg7: memref<1x96xf32, #tpu.memory_space<vmem>>, %arg8: memref<1x96xf32, #tpu.memory_space<vmem>>, %arg9: memref<32x96xf32, #tpu.memory_space<vmem>>, %arg10: memref<32x96xf32, #tpu.memory_space<vmem>>, %arg11: memref<1x96xf32, #tpu.memory_space<vmem>>, %arg12: memref<1x96xf32, #tpu.memory_space<vmem>>, %arg13: memref<32x32xf32, #tpu.memory_space<vmem>>, %arg14: memref<1x32xf32, #tpu.memory_space<vmem>>, %arg15: memref<32x12xf32, #tpu.memory_space<vmem>>, %arg16: memref<1x12xf32, #tpu.memory_space<vmem>>, %arg17: memref<16x1xi32, #tpu.memory_space<vmem>>, %arg18: memref<1x1xf32, #tpu.memory_space<vmem>>) attributes {dimension_semantics = [], scalar_prefetch = 0 : i64, scratch_operands = 0 : i64, tpu.core_type = #tpu.core_type<tc>} {
    %0 = tpu.iota {dimensions = array<i32: 1>} : vector<16x12xi32>
    %c0 = arith.constant 0 : index
    %c0_0 = arith.constant 0 : index
    %1 = vector.load %arg1[%c0, %c0_0] : memref<16x1xi32, #tpu.memory_space<vmem>>, vector<16x1xi32>
    %2 = vector.broadcast %1 : vector<16x1xi32> to vector<16x12xi32>
    %3 = arith.cmpi eq, %2, %0 : vector<16x12xi32>
    %4 = arith.extui %3 : vector<16x12xi1> to vector<16x12xi32>
    %5 = arith.sitofp %4 : vector<16x12xi32> to vector<16x12xf32>
    %c0_1 = arith.constant 0 : index
    %c0_2 = arith.constant 0 : index
    %6 = vector.load %arg4[%c0_1, %c0_2] : memref<12x16xf32, #tpu.memory_space<vmem>>, vector<12x16xf32>
    %cst = arith.constant dense<0.000000e+00> : vector<16x16xf32>
    %7 = tpu.matmul %5, %6, %cst {dimension_numbers = #tpu.dot_dimension_numbers<[1], [0], [0], [1], [0, 0, 1, 1], [], []>} : vector<16x12xf32>, vector<12x16xf32>, vector<16x16xf32> -> vector<16x16xf32>
    %c0_3 = arith.constant 0 : index
    %c0_4 = arith.constant 0 : index
    %8 = vector.load %arg3[%c0_3, %c0_4] : memref<2x16xf32, #tpu.memory_space<vmem>>, vector<2x16xf32>
    %9 = tpu.concatenate %8, %8, %8, %8, %8, %8, %8, %8 in 0 : vector<2x16xf32>, vector<2x16xf32>, vector<2x16xf32>, vector<2x16xf32>, vector<2x16xf32>, vector<2x16xf32>, vector<2x16xf32>, vector<2x16xf32> -> vector<16x16xf32>
    %10 = arith.addf %7, %9 : vector<16x16xf32>
    %c0_5 = arith.constant 0 : index
    %c0_6 = arith.constant 0 : index
    %11 = vector.load %arg5[%c0_5, %c0_6] : memref<16x96xf32, #tpu.memory_space<vmem>>, vector<16x96xf32>
    %c0_7 = arith.constant 0 : index
    %c0_8 = arith.constant 0 : index
    %12 = vector.load %arg6[%c0_7, %c0_8] : memref<32x96xf32, #tpu.memory_space<vmem>>, vector<32x96xf32>
    %c0_9 = arith.constant 0 : index
    %c0_10 = arith.constant 0 : index
    %13 = vector.load %arg7[%c0_9, %c0_10] : memref<1x96xf32, #tpu.memory_space<vmem>>, vector<1x96xf32>
    %c0_11 = arith.constant 0 : index
    %c0_12 = arith.constant 0 : index
    %14 = vector.load %arg8[%c0_11, %c0_12] : memref<1x96xf32, #tpu.memory_space<vmem>>, vector<1x96xf32>
    %c0_13 = arith.constant 0 : index
    %c0_14 = arith.constant 0 : index
    %15 = vector.load %arg9[%c0_13, %c0_14] : memref<32x96xf32, #tpu.memory_space<vmem>>, vector<32x96xf32>
    %c0_15 = arith.constant 0 : index
    %c0_16 = arith.constant 0 : index
    %16 = vector.load %arg10[%c0_15, %c0_16] : memref<32x96xf32, #tpu.memory_space<vmem>>, vector<32x96xf32>
    %c0_17 = arith.constant 0 : index
    %c0_18 = arith.constant 0 : index
    %17 = vector.load %arg11[%c0_17, %c0_18] : memref<1x96xf32, #tpu.memory_space<vmem>>, vector<1x96xf32>
    %c0_19 = arith.constant 0 : index
    %c0_20 = arith.constant 0 : index
    %18 = vector.load %arg12[%c0_19, %c0_20] : memref<1x96xf32, #tpu.memory_space<vmem>>, vector<1x96xf32>
    %cst_21 = arith.constant dense<0.000000e+00> : vector<16x96xf32>
    %19 = tpu.matmul %10, %11, %cst_21 {dimension_numbers = #tpu.dot_dimension_numbers<[1], [0], [0], [1], [0, 0, 1, 1], [], []>} : vector<16x16xf32>, vector<16x96xf32>, vector<16x96xf32> -> vector<16x96xf32>
    %20 = vector.broadcast %13 : vector<1x96xf32> to vector<16x96xf32>
    %21 = arith.addf %19, %20 : vector<16x96xf32>
    %cst_22 = arith.constant 0.000000e+00 : f32
    %22 = vector.broadcast %cst_22 : f32 to vector<2x32xf32>
    %cst_23 = arith.constant 0.000000e+00 : f32
    %23 = vector.broadcast %cst_23 : f32 to vector<2x32xf32>
    %24 = vector.extract_strided_slice %21 {offsets = [0, 0], sizes = [2, 96], strides = [1, 1]} : vector<16x96xf32> to vector<2x96xf32>
    %cst_24 = arith.constant dense<0.000000e+00> : vector<2x96xf32>
    %25 = tpu.matmul %22, %12, %cst_24 {dimension_numbers = #tpu.dot_dimension_numbers<[1], [0], [0], [1], [0, 0, 1, 1], [], []>} : vector<2x32xf32>, vector<32x96xf32>, vector<2x96xf32> -> vector<2x96xf32>
    %26 = vector.broadcast %14 : vector<1x96xf32> to vector<2x96xf32>
    %27 = arith.addf %25, %26 : vector<2x96xf32>
    %28 = vector.extract_strided_slice %24 {offsets = [0, 0], sizes = [2, 32], strides = [1, 1]} : vector<2x96xf32> to vector<2x32xf32>
    %29 = vector.extract_strided_slice %27 {offsets = [0, 0], sizes = [2, 32], strides = [1, 1]} : vector<2x96xf32> to vector<2x32xf32>
    %30 = arith.addf %28, %29 : vector<2x32xf32>
    %31 = arith.negf %30 : vector<2x32xf32>
    %32 = math.exp %31 : vector<2x32xf32>
    %cst_25 = arith.constant 1.000000e+00 : f32
    %33 = vector.broadcast %cst_25 : f32 to vector<2x32xf32>
    %34 = arith.addf %33, %32 : vector<2x32xf32>
    %35 = arith.divf %33, %34 : vector<2x32xf32>
    %36 = vector.extract_strided_slice %24 {offsets = [0, 32], sizes = [2, 32], strides = [1, 1]} : vector<2x96xf32> to vector<2x32xf32>
    %37 = vector.extract_strided_slice %27 {offsets = [0, 32], sizes = [2, 32], strides = [1, 1]} : vector<2x96xf32> to vector<2x32xf32>
    %38 = arith.addf %36, %37 : vector<2x32xf32>
    %39 = arith.negf %38 : vector<2x32xf32>
    %40 = math.exp %39 : vector<2x32xf32>
    %cst_26 = arith.constant 1.000000e+00 : f32
    %41 = vector.broadcast %cst_26 : f32 to vector<2x32xf32>
    %42 = arith.addf %41, %40 : vector<2x32xf32>
    %43 = arith.divf %41, %42 : vector<2x32xf32>
    %44 = vector.extract_strided_slice %24 {offsets = [0, 64], sizes = [2, 32], strides = [1, 1]} : vector<2x96xf32> to vector<2x32xf32>
    %45 = vector.extract_strided_slice %27 {offsets = [0, 64], sizes = [2, 32], strides = [1, 1]} : vector<2x96xf32> to vector<2x32xf32>
    %46 = arith.mulf %35, %45 : vector<2x32xf32>
    %47 = arith.addf %44, %46 : vector<2x32xf32>
    %48 = math.tanh %47 : vector<2x32xf32>
    %cst_27 = arith.constant 1.000000e+00 : f32
    %49 = vector.broadcast %cst_27 : f32 to vector<2x32xf32>
    %50 = arith.subf %49, %43 : vector<2x32xf32>
    %51 = arith.mulf %50, %48 : vector<2x32xf32>
    %52 = arith.mulf %43, %22 : vector<2x32xf32>
    %53 = arith.addf %51, %52 : vector<2x32xf32>
    %cst_28 = arith.constant dense<0.000000e+00> : vector<2x96xf32>
    %54 = tpu.matmul %53, %15, %cst_28 {dimension_numbers = #tpu.dot_dimension_numbers<[1], [0], [0], [1], [0, 0, 1, 1], [], []>} : vector<2x32xf32>, vector<32x96xf32>, vector<2x96xf32> -> vector<2x96xf32>
    %55 = vector.broadcast %17 : vector<1x96xf32> to vector<2x96xf32>
    %56 = arith.addf %54, %55 : vector<2x96xf32>
    %cst_29 = arith.constant dense<0.000000e+00> : vector<2x96xf32>
    %57 = tpu.matmul %23, %16, %cst_29 {dimension_numbers = #tpu.dot_dimension_numbers<[1], [0], [0], [1], [0, 0, 1, 1], [], []>} : vector<2x32xf32>, vector<32x96xf32>, vector<2x96xf32> -> vector<2x96xf32>
    %58 = vector.broadcast %18 : vector<1x96xf32> to vector<2x96xf32>
    %59 = arith.addf %57, %58 : vector<2x96xf32>
    %60 = vector.extract_strided_slice %56 {offsets = [0, 0], sizes = [2, 32], strides = [1, 1]} : vector<2x96xf32> to vector<2x32xf32>
    %61 = vector.extract_strided_slice %59 {offsets = [0, 0], sizes = [2, 32], strides = [1, 1]} : vector<2x96xf32> to vector<2x32xf32>
    %62 = arith.addf %60, %61 : vector<2x32xf32>
    %63 = arith.negf %62 : vector<2x32xf32>
    %64 = math.exp %63 : vector<2x32xf32>
    %cst_30 = arith.constant 1.000000e+00 : f32
    %65 = vector.broadcast %cst_30 : f32 to vector<2x32xf32>
    %66 = arith.addf %65, %64 : vector<2x32xf32>
    %67 = arith.divf %65, %66 : vector<2x32xf32>
    %68 = vector.extract_strided_slice %56 {offsets = [0, 32], sizes = [2, 32], strides = [1, 1]} : vector<2x96xf32> to vector<2x32xf32>
    %69 = vector.extract_strided_slice %59 {offsets = [0, 32], sizes = [2, 32], strides = [1, 1]} : vector<2x96xf32> to vector<2x32xf32>
    %70 = arith.addf %68, %69 : vector<2x32xf32>
    %71 = arith.negf %70 : vector<2x32xf32>
    %72 = math.exp %71 : vector<2x32xf32>
    %cst_31 = arith.constant 1.000000e+00 : f32
    %73 = vector.broadcast %cst_31 : f32 to vector<2x32xf32>
    %74 = arith.addf %73, %72 : vector<2x32xf32>
    %75 = arith.divf %73, %74 : vector<2x32xf32>
    %76 = vector.extract_strided_slice %56 {offsets = [0, 64], sizes = [2, 32], strides = [1, 1]} : vector<2x96xf32> to vector<2x32xf32>
    %77 = vector.extract_strided_slice %59 {offsets = [0, 64], sizes = [2, 32], strides = [1, 1]} : vector<2x96xf32> to vector<2x32xf32>
    %78 = arith.mulf %67, %77 : vector<2x32xf32>
    %79 = arith.addf %76, %78 : vector<2x32xf32>
    %80 = math.tanh %79 : vector<2x32xf32>
    %cst_32 = arith.constant 1.000000e+00 : f32
    %81 = vector.broadcast %cst_32 : f32 to vector<2x32xf32>
    %82 = arith.subf %81, %75 : vector<2x32xf32>
    %83 = arith.mulf %82, %80 : vector<2x32xf32>
    %84 = arith.mulf %75, %23 : vector<2x32xf32>
    %85 = arith.addf %83, %84 : vector<2x32xf32>
    %86 = vector.extract_strided_slice %21 {offsets = [2, 0], sizes = [2, 96], strides = [1, 1]} : vector<16x96xf32> to vector<2x96xf32>
    %cst_33 = arith.constant dense<0.000000e+00> : vector<2x96xf32>
    %87 = tpu.matmul %53, %12, %cst_33 {dimension_numbers = #tpu.dot_dimension_numbers<[1], [0], [0], [1], [0, 0, 1, 1], [], []>} : vector<2x32xf32>, vector<32x96xf32>, vector<2x96xf32> -> vector<2x96xf32>
    %88 = vector.broadcast %14 : vector<1x96xf32> to vector<2x96xf32>
    %89 = arith.addf %87, %88 : vector<2x96xf32>
    %90 = vector.extract_strided_slice %86 {offsets = [0, 0], sizes = [2, 32], strides = [1, 1]} : vector<2x96xf32> to vector<2x32xf32>
    %91 = vector.extract_strided_slice %89 {offsets = [0, 0], sizes = [2, 32], strides = [1, 1]} : vector<2x96xf32> to vector<2x32xf32>
    %92 = arith.addf %90, %91 : vector<2x32xf32>
    %93 = arith.negf %92 : vector<2x32xf32>
    %94 = math.exp %93 : vector<2x32xf32>
    %cst_34 = arith.constant 1.000000e+00 : f32
    %95 = vector.broadcast %cst_34 : f32 to vector<2x32xf32>
    %96 = arith.addf %95, %94 : vector<2x32xf32>
    %97 = arith.divf %95, %96 : vector<2x32xf32>
    %98 = vector.extract_strided_slice %86 {offsets = [0, 32], sizes = [2, 32], strides = [1, 1]} : vector<2x96xf32> to vector<2x32xf32>
    %99 = vector.extract_strided_slice %89 {offsets = [0, 32], sizes = [2, 32], strides = [1, 1]} : vector<2x96xf32> to vector<2x32xf32>
    %100 = arith.addf %98, %99 : vector<2x32xf32>
    %101 = arith.negf %100 : vector<2x32xf32>
    %102 = math.exp %101 : vector<2x32xf32>
    %cst_35 = arith.constant 1.000000e+00 : f32
    %103 = vector.broadcast %cst_35 : f32 to vector<2x32xf32>
    %104 = arith.addf %103, %102 : vector<2x32xf32>
    %105 = arith.divf %103, %104 : vector<2x32xf32>
    %106 = vector.extract_strided_slice %86 {offsets = [0, 64], sizes = [2, 32], strides = [1, 1]} : vector<2x96xf32> to vector<2x32xf32>
    %107 = vector.extract_strided_slice %89 {offsets = [0, 64], sizes = [2, 32], strides = [1, 1]} : vector<2x96xf32> to vector<2x32xf32>
    %108 = arith.mulf %97, %107 : vector<2x32xf32>
    %109 = arith.addf %106, %108 : vector<2x32xf32>
    %110 = math.tanh %109 : vector<2x32xf32>
    %cst_36 = arith.constant 1.000000e+00 : f32
    %111 = vector.broadcast %cst_36 : f32 to vector<2x32xf32>
    %112 = arith.subf %111, %105 : vector<2x32xf32>
    %113 = arith.mulf %112, %110 : vector<2x32xf32>
    %114 = arith.mulf %105, %53 : vector<2x32xf32>
    %115 = arith.addf %113, %114 : vector<2x32xf32>
    %cst_37 = arith.constant dense<0.000000e+00> : vector<2x96xf32>
    %116 = tpu.matmul %115, %15, %cst_37 {dimension_numbers = #tpu.dot_dimension_numbers<[1], [0], [0], [1], [0, 0, 1, 1], [], []>} : vector<2x32xf32>, vector<32x96xf32>, vector<2x96xf32> -> vector<2x96xf32>
    %117 = vector.broadcast %17 : vector<1x96xf32> to vector<2x96xf32>
    %118 = arith.addf %116, %117 : vector<2x96xf32>
    %cst_38 = arith.constant dense<0.000000e+00> : vector<2x96xf32>
    %119 = tpu.matmul %85, %16, %cst_38 {dimension_numbers = #tpu.dot_dimension_numbers<[1], [0], [0], [1], [0, 0, 1, 1], [], []>} : vector<2x32xf32>, vector<32x96xf32>, vector<2x96xf32> -> vector<2x96xf32>
    %120 = vector.broadcast %18 : vector<1x96xf32> to vector<2x96xf32>
    %121 = arith.addf %119, %120 : vector<2x96xf32>
    %122 = vector.extract_strided_slice %118 {offsets = [0, 0], sizes = [2, 32], strides = [1, 1]} : vector<2x96xf32> to vector<2x32xf32>
    %123 = vector.extract_strided_slice %121 {offsets = [0, 0], sizes = [2, 32], strides = [1, 1]} : vector<2x96xf32> to vector<2x32xf32>
    %124 = arith.addf %122, %123 : vector<2x32xf32>
    %125 = arith.negf %124 : vector<2x32xf32>
    %126 = math.exp %125 : vector<2x32xf32>
    %cst_39 = arith.constant 1.000000e+00 : f32
    %127 = vector.broadcast %cst_39 : f32 to vector<2x32xf32>
    %128 = arith.addf %127, %126 : vector<2x32xf32>
    %129 = arith.divf %127, %128 : vector<2x32xf32>
    %130 = vector.extract_strided_slice %118 {offsets = [0, 32], sizes = [2, 32], strides = [1, 1]} : vector<2x96xf32> to vector<2x32xf32>
    %131 = vector.extract_strided_slice %121 {offsets = [0, 32], sizes = [2, 32], strides = [1, 1]} : vector<2x96xf32> to vector<2x32xf32>
    %132 = arith.addf %130, %131 : vector<2x32xf32>
    %133 = arith.negf %132 : vector<2x32xf32>
    %134 = math.exp %133 : vector<2x32xf32>
    %cst_40 = arith.constant 1.000000e+00 : f32
    %135 = vector.broadcast %cst_40 : f32 to vector<2x32xf32>
    %136 = arith.addf %135, %134 : vector<2x32xf32>
    %137 = arith.divf %135, %136 : vector<2x32xf32>
    %138 = vector.extract_strided_slice %118 {offsets = [0, 64], sizes = [2, 32], strides = [1, 1]} : vector<2x96xf32> to vector<2x32xf32>
    %139 = vector.extract_strided_slice %121 {offsets = [0, 64], sizes = [2, 32], strides = [1, 1]} : vector<2x96xf32> to vector<2x32xf32>
    %140 = arith.mulf %129, %139 : vector<2x32xf32>
    %141 = arith.addf %138, %140 : vector<2x32xf32>
    %142 = math.tanh %141 : vector<2x32xf32>
    %cst_41 = arith.constant 1.000000e+00 : f32
    %143 = vector.broadcast %cst_41 : f32 to vector<2x32xf32>
    %144 = arith.subf %143, %137 : vector<2x32xf32>
    %145 = arith.mulf %144, %142 : vector<2x32xf32>
    %146 = arith.mulf %137, %85 : vector<2x32xf32>
    %147 = arith.addf %145, %146 : vector<2x32xf32>
    %148 = vector.extract_strided_slice %21 {offsets = [4, 0], sizes = [2, 96], strides = [1, 1]} : vector<16x96xf32> to vector<2x96xf32>
    %cst_42 = arith.constant dense<0.000000e+00> : vector<2x96xf32>
    %149 = tpu.matmul %115, %12, %cst_42 {dimension_numbers = #tpu.dot_dimension_numbers<[1], [0], [0], [1], [0, 0, 1, 1], [], []>} : vector<2x32xf32>, vector<32x96xf32>, vector<2x96xf32> -> vector<2x96xf32>
    %150 = vector.broadcast %14 : vector<1x96xf32> to vector<2x96xf32>
    %151 = arith.addf %149, %150 : vector<2x96xf32>
    %152 = vector.extract_strided_slice %148 {offsets = [0, 0], sizes = [2, 32], strides = [1, 1]} : vector<2x96xf32> to vector<2x32xf32>
    %153 = vector.extract_strided_slice %151 {offsets = [0, 0], sizes = [2, 32], strides = [1, 1]} : vector<2x96xf32> to vector<2x32xf32>
    %154 = arith.addf %152, %153 : vector<2x32xf32>
    %155 = arith.negf %154 : vector<2x32xf32>
    %156 = math.exp %155 : vector<2x32xf32>
    %cst_43 = arith.constant 1.000000e+00 : f32
    %157 = vector.broadcast %cst_43 : f32 to vector<2x32xf32>
    %158 = arith.addf %157, %156 : vector<2x32xf32>
    %159 = arith.divf %157, %158 : vector<2x32xf32>
    %160 = vector.extract_strided_slice %148 {offsets = [0, 32], sizes = [2, 32], strides = [1, 1]} : vector<2x96xf32> to vector<2x32xf32>
    %161 = vector.extract_strided_slice %151 {offsets = [0, 32], sizes = [2, 32], strides = [1, 1]} : vector<2x96xf32> to vector<2x32xf32>
    %162 = arith.addf %160, %161 : vector<2x32xf32>
    %163 = arith.negf %162 : vector<2x32xf32>
    %164 = math.exp %163 : vector<2x32xf32>
    %cst_44 = arith.constant 1.000000e+00 : f32
    %165 = vector.broadcast %cst_44 : f32 to vector<2x32xf32>
    %166 = arith.addf %165, %164 : vector<2x32xf32>
    %167 = arith.divf %165, %166 : vector<2x32xf32>
    %168 = vector.extract_strided_slice %148 {offsets = [0, 64], sizes = [2, 32], strides = [1, 1]} : vector<2x96xf32> to vector<2x32xf32>
    %169 = vector.extract_strided_slice %151 {offsets = [0, 64], sizes = [2, 32], strides = [1, 1]} : vector<2x96xf32> to vector<2x32xf32>
    %170 = arith.mulf %159, %169 : vector<2x32xf32>
    %171 = arith.addf %168, %170 : vector<2x32xf32>
    %172 = math.tanh %171 : vector<2x32xf32>
    %cst_45 = arith.constant 1.000000e+00 : f32
    %173 = vector.broadcast %cst_45 : f32 to vector<2x32xf32>
    %174 = arith.subf %173, %167 : vector<2x32xf32>
    %175 = arith.mulf %174, %172 : vector<2x32xf32>
    %176 = arith.mulf %167, %115 : vector<2x32xf32>
    %177 = arith.addf %175, %176 : vector<2x32xf32>
    %cst_46 = arith.constant dense<0.000000e+00> : vector<2x96xf32>
    %178 = tpu.matmul %177, %15, %cst_46 {dimension_numbers = #tpu.dot_dimension_numbers<[1], [0], [0], [1], [0, 0, 1, 1], [], []>} : vector<2x32xf32>, vector<32x96xf32>, vector<2x96xf32> -> vector<2x96xf32>
    %179 = vector.broadcast %17 : vector<1x96xf32> to vector<2x96xf32>
    %180 = arith.addf %178, %179 : vector<2x96xf32>
    %cst_47 = arith.constant dense<0.000000e+00> : vector<2x96xf32>
    %181 = tpu.matmul %147, %16, %cst_47 {dimension_numbers = #tpu.dot_dimension_numbers<[1], [0], [0], [1], [0, 0, 1, 1], [], []>} : vector<2x32xf32>, vector<32x96xf32>, vector<2x96xf32> -> vector<2x96xf32>
    %182 = vector.broadcast %18 : vector<1x96xf32> to vector<2x96xf32>
    %183 = arith.addf %181, %182 : vector<2x96xf32>
    %184 = vector.extract_strided_slice %180 {offsets = [0, 0], sizes = [2, 32], strides = [1, 1]} : vector<2x96xf32> to vector<2x32xf32>
    %185 = vector.extract_strided_slice %183 {offsets = [0, 0], sizes = [2, 32], strides = [1, 1]} : vector<2x96xf32> to vector<2x32xf32>
    %186 = arith.addf %184, %185 : vector<2x32xf32>
    %187 = arith.negf %186 : vector<2x32xf32>
    %188 = math.exp %187 : vector<2x32xf32>
    %cst_48 = arith.constant 1.000000e+00 : f32
    %189 = vector.broadcast %cst_48 : f32 to vector<2x32xf32>
    %190 = arith.addf %189, %188 : vector<2x32xf32>
    %191 = arith.divf %189, %190 : vector<2x32xf32>
    %192 = vector.extract_strided_slice %180 {offsets = [0, 32], sizes = [2, 32], strides = [1, 1]} : vector<2x96xf32> to vector<2x32xf32>
    %193 = vector.extract_strided_slice %183 {offsets = [0, 32], sizes = [2, 32], strides = [1, 1]} : vector<2x96xf32> to vector<2x32xf32>
    %194 = arith.addf %192, %193 : vector<2x32xf32>
    %195 = arith.negf %194 : vector<2x32xf32>
    %196 = math.exp %195 : vector<2x32xf32>
    %cst_49 = arith.constant 1.000000e+00 : f32
    %197 = vector.broadcast %cst_49 : f32 to vector<2x32xf32>
    %198 = arith.addf %197, %196 : vector<2x32xf32>
    %199 = arith.divf %197, %198 : vector<2x32xf32>
    %200 = vector.extract_strided_slice %180 {offsets = [0, 64], sizes = [2, 32], strides = [1, 1]} : vector<2x96xf32> to vector<2x32xf32>
    %201 = vector.extract_strided_slice %183 {offsets = [0, 64], sizes = [2, 32], strides = [1, 1]} : vector<2x96xf32> to vector<2x32xf32>
    %202 = arith.mulf %191, %201 : vector<2x32xf32>
    %203 = arith.addf %200, %202 : vector<2x32xf32>
    %204 = math.tanh %203 : vector<2x32xf32>
    %cst_50 = arith.constant 1.000000e+00 : f32
    %205 = vector.broadcast %cst_50 : f32 to vector<2x32xf32>
    %206 = arith.subf %205, %199 : vector<2x32xf32>
    %207 = arith.mulf %206, %204 : vector<2x32xf32>
    %208 = arith.mulf %199, %147 : vector<2x32xf32>
    %209 = arith.addf %207, %208 : vector<2x32xf32>
    %210 = vector.extract_strided_slice %21 {offsets = [6, 0], sizes = [2, 96], strides = [1, 1]} : vector<16x96xf32> to vector<2x96xf32>
    %cst_51 = arith.constant dense<0.000000e+00> : vector<2x96xf32>
    %211 = tpu.matmul %177, %12, %cst_51 {dimension_numbers = #tpu.dot_dimension_numbers<[1], [0], [0], [1], [0, 0, 1, 1], [], []>} : vector<2x32xf32>, vector<32x96xf32>, vector<2x96xf32> -> vector<2x96xf32>
    %212 = vector.broadcast %14 : vector<1x96xf32> to vector<2x96xf32>
    %213 = arith.addf %211, %212 : vector<2x96xf32>
    %214 = vector.extract_strided_slice %210 {offsets = [0, 0], sizes = [2, 32], strides = [1, 1]} : vector<2x96xf32> to vector<2x32xf32>
    %215 = vector.extract_strided_slice %213 {offsets = [0, 0], sizes = [2, 32], strides = [1, 1]} : vector<2x96xf32> to vector<2x32xf32>
    %216 = arith.addf %214, %215 : vector<2x32xf32>
    %217 = arith.negf %216 : vector<2x32xf32>
    %218 = math.exp %217 : vector<2x32xf32>
    %cst_52 = arith.constant 1.000000e+00 : f32
    %219 = vector.broadcast %cst_52 : f32 to vector<2x32xf32>
    %220 = arith.addf %219, %218 : vector<2x32xf32>
    %221 = arith.divf %219, %220 : vector<2x32xf32>
    %222 = vector.extract_strided_slice %210 {offsets = [0, 32], sizes = [2, 32], strides = [1, 1]} : vector<2x96xf32> to vector<2x32xf32>
    %223 = vector.extract_strided_slice %213 {offsets = [0, 32], sizes = [2, 32], strides = [1, 1]} : vector<2x96xf32> to vector<2x32xf32>
    %224 = arith.addf %222, %223 : vector<2x32xf32>
    %225 = arith.negf %224 : vector<2x32xf32>
    %226 = math.exp %225 : vector<2x32xf32>
    %cst_53 = arith.constant 1.000000e+00 : f32
    %227 = vector.broadcast %cst_53 : f32 to vector<2x32xf32>
    %228 = arith.addf %227, %226 : vector<2x32xf32>
    %229 = arith.divf %227, %228 : vector<2x32xf32>
    %230 = vector.extract_strided_slice %210 {offsets = [0, 64], sizes = [2, 32], strides = [1, 1]} : vector<2x96xf32> to vector<2x32xf32>
    %231 = vector.extract_strided_slice %213 {offsets = [0, 64], sizes = [2, 32], strides = [1, 1]} : vector<2x96xf32> to vector<2x32xf32>
    %232 = arith.mulf %221, %231 : vector<2x32xf32>
    %233 = arith.addf %230, %232 : vector<2x32xf32>
    %234 = math.tanh %233 : vector<2x32xf32>
    %cst_54 = arith.constant 1.000000e+00 : f32
    %235 = vector.broadcast %cst_54 : f32 to vector<2x32xf32>
    %236 = arith.subf %235, %229 : vector<2x32xf32>
    %237 = arith.mulf %236, %234 : vector<2x32xf32>
    %238 = arith.mulf %229, %177 : vector<2x32xf32>
    %239 = arith.addf %237, %238 : vector<2x32xf32>
    %cst_55 = arith.constant dense<0.000000e+00> : vector<2x96xf32>
    %240 = tpu.matmul %239, %15, %cst_55 {dimension_numbers = #tpu.dot_dimension_numbers<[1], [0], [0], [1], [0, 0, 1, 1], [], []>} : vector<2x32xf32>, vector<32x96xf32>, vector<2x96xf32> -> vector<2x96xf32>
    %241 = vector.broadcast %17 : vector<1x96xf32> to vector<2x96xf32>
    %242 = arith.addf %240, %241 : vector<2x96xf32>
    %cst_56 = arith.constant dense<0.000000e+00> : vector<2x96xf32>
    %243 = tpu.matmul %209, %16, %cst_56 {dimension_numbers = #tpu.dot_dimension_numbers<[1], [0], [0], [1], [0, 0, 1, 1], [], []>} : vector<2x32xf32>, vector<32x96xf32>, vector<2x96xf32> -> vector<2x96xf32>
    %244 = vector.broadcast %18 : vector<1x96xf32> to vector<2x96xf32>
    %245 = arith.addf %243, %244 : vector<2x96xf32>
    %246 = vector.extract_strided_slice %242 {offsets = [0, 0], sizes = [2, 32], strides = [1, 1]} : vector<2x96xf32> to vector<2x32xf32>
    %247 = vector.extract_strided_slice %245 {offsets = [0, 0], sizes = [2, 32], strides = [1, 1]} : vector<2x96xf32> to vector<2x32xf32>
    %248 = arith.addf %246, %247 : vector<2x32xf32>
    %249 = arith.negf %248 : vector<2x32xf32>
    %250 = math.exp %249 : vector<2x32xf32>
    %cst_57 = arith.constant 1.000000e+00 : f32
    %251 = vector.broadcast %cst_57 : f32 to vector<2x32xf32>
    %252 = arith.addf %251, %250 : vector<2x32xf32>
    %253 = arith.divf %251, %252 : vector<2x32xf32>
    %254 = vector.extract_strided_slice %242 {offsets = [0, 32], sizes = [2, 32], strides = [1, 1]} : vector<2x96xf32> to vector<2x32xf32>
    %255 = vector.extract_strided_slice %245 {offsets = [0, 32], sizes = [2, 32], strides = [1, 1]} : vector<2x96xf32> to vector<2x32xf32>
    %256 = arith.addf %254, %255 : vector<2x32xf32>
    %257 = arith.negf %256 : vector<2x32xf32>
    %258 = math.exp %257 : vector<2x32xf32>
    %cst_58 = arith.constant 1.000000e+00 : f32
    %259 = vector.broadcast %cst_58 : f32 to vector<2x32xf32>
    %260 = arith.addf %259, %258 : vector<2x32xf32>
    %261 = arith.divf %259, %260 : vector<2x32xf32>
    %262 = vector.extract_strided_slice %242 {offsets = [0, 64], sizes = [2, 32], strides = [1, 1]} : vector<2x96xf32> to vector<2x32xf32>
    %263 = vector.extract_strided_slice %245 {offsets = [0, 64], sizes = [2, 32], strides = [1, 1]} : vector<2x96xf32> to vector<2x32xf32>
    %264 = arith.mulf %253, %263 : vector<2x32xf32>
    %265 = arith.addf %262, %264 : vector<2x32xf32>
    %266 = math.tanh %265 : vector<2x32xf32>
    %cst_59 = arith.constant 1.000000e+00 : f32
    %267 = vector.broadcast %cst_59 : f32 to vector<2x32xf32>
    %268 = arith.subf %267, %261 : vector<2x32xf32>
    %269 = arith.mulf %268, %266 : vector<2x32xf32>
    %270 = arith.mulf %261, %209 : vector<2x32xf32>
    %271 = arith.addf %269, %270 : vector<2x32xf32>
    %272 = vector.extract_strided_slice %21 {offsets = [8, 0], sizes = [2, 96], strides = [1, 1]} : vector<16x96xf32> to vector<2x96xf32>
    %cst_60 = arith.constant dense<0.000000e+00> : vector<2x96xf32>
    %273 = tpu.matmul %239, %12, %cst_60 {dimension_numbers = #tpu.dot_dimension_numbers<[1], [0], [0], [1], [0, 0, 1, 1], [], []>} : vector<2x32xf32>, vector<32x96xf32>, vector<2x96xf32> -> vector<2x96xf32>
    %274 = vector.broadcast %14 : vector<1x96xf32> to vector<2x96xf32>
    %275 = arith.addf %273, %274 : vector<2x96xf32>
    %276 = vector.extract_strided_slice %272 {offsets = [0, 0], sizes = [2, 32], strides = [1, 1]} : vector<2x96xf32> to vector<2x32xf32>
    %277 = vector.extract_strided_slice %275 {offsets = [0, 0], sizes = [2, 32], strides = [1, 1]} : vector<2x96xf32> to vector<2x32xf32>
    %278 = arith.addf %276, %277 : vector<2x32xf32>
    %279 = arith.negf %278 : vector<2x32xf32>
    %280 = math.exp %279 : vector<2x32xf32>
    %cst_61 = arith.constant 1.000000e+00 : f32
    %281 = vector.broadcast %cst_61 : f32 to vector<2x32xf32>
    %282 = arith.addf %281, %280 : vector<2x32xf32>
    %283 = arith.divf %281, %282 : vector<2x32xf32>
    %284 = vector.extract_strided_slice %272 {offsets = [0, 32], sizes = [2, 32], strides = [1, 1]} : vector<2x96xf32> to vector<2x32xf32>
    %285 = vector.extract_strided_slice %275 {offsets = [0, 32], sizes = [2, 32], strides = [1, 1]} : vector<2x96xf32> to vector<2x32xf32>
    %286 = arith.addf %284, %285 : vector<2x32xf32>
    %287 = arith.negf %286 : vector<2x32xf32>
    %288 = math.exp %287 : vector<2x32xf32>
    %cst_62 = arith.constant 1.000000e+00 : f32
    %289 = vector.broadcast %cst_62 : f32 to vector<2x32xf32>
    %290 = arith.addf %289, %288 : vector<2x32xf32>
    %291 = arith.divf %289, %290 : vector<2x32xf32>
    %292 = vector.extract_strided_slice %272 {offsets = [0, 64], sizes = [2, 32], strides = [1, 1]} : vector<2x96xf32> to vector<2x32xf32>
    %293 = vector.extract_strided_slice %275 {offsets = [0, 64], sizes = [2, 32], strides = [1, 1]} : vector<2x96xf32> to vector<2x32xf32>
    %294 = arith.mulf %283, %293 : vector<2x32xf32>
    %295 = arith.addf %292, %294 : vector<2x32xf32>
    %296 = math.tanh %295 : vector<2x32xf32>
    %cst_63 = arith.constant 1.000000e+00 : f32
    %297 = vector.broadcast %cst_63 : f32 to vector<2x32xf32>
    %298 = arith.subf %297, %291 : vector<2x32xf32>
    %299 = arith.mulf %298, %296 : vector<2x32xf32>
    %300 = arith.mulf %291, %239 : vector<2x32xf32>
    %301 = arith.addf %299, %300 : vector<2x32xf32>
    %cst_64 = arith.constant dense<0.000000e+00> : vector<2x96xf32>
    %302 = tpu.matmul %301, %15, %cst_64 {dimension_numbers = #tpu.dot_dimension_numbers<[1], [0], [0], [1], [0, 0, 1, 1], [], []>} : vector<2x32xf32>, vector<32x96xf32>, vector<2x96xf32> -> vector<2x96xf32>
    %303 = vector.broadcast %17 : vector<1x96xf32> to vector<2x96xf32>
    %304 = arith.addf %302, %303 : vector<2x96xf32>
    %cst_65 = arith.constant dense<0.000000e+00> : vector<2x96xf32>
    %305 = tpu.matmul %271, %16, %cst_65 {dimension_numbers = #tpu.dot_dimension_numbers<[1], [0], [0], [1], [0, 0, 1, 1], [], []>} : vector<2x32xf32>, vector<32x96xf32>, vector<2x96xf32> -> vector<2x96xf32>
    %306 = vector.broadcast %18 : vector<1x96xf32> to vector<2x96xf32>
    %307 = arith.addf %305, %306 : vector<2x96xf32>
    %308 = vector.extract_strided_slice %304 {offsets = [0, 0], sizes = [2, 32], strides = [1, 1]} : vector<2x96xf32> to vector<2x32xf32>
    %309 = vector.extract_strided_slice %307 {offsets = [0, 0], sizes = [2, 32], strides = [1, 1]} : vector<2x96xf32> to vector<2x32xf32>
    %310 = arith.addf %308, %309 : vector<2x32xf32>
    %311 = arith.negf %310 : vector<2x32xf32>
    %312 = math.exp %311 : vector<2x32xf32>
    %cst_66 = arith.constant 1.000000e+00 : f32
    %313 = vector.broadcast %cst_66 : f32 to vector<2x32xf32>
    %314 = arith.addf %313, %312 : vector<2x32xf32>
    %315 = arith.divf %313, %314 : vector<2x32xf32>
    %316 = vector.extract_strided_slice %304 {offsets = [0, 32], sizes = [2, 32], strides = [1, 1]} : vector<2x96xf32> to vector<2x32xf32>
    %317 = vector.extract_strided_slice %307 {offsets = [0, 32], sizes = [2, 32], strides = [1, 1]} : vector<2x96xf32> to vector<2x32xf32>
    %318 = arith.addf %316, %317 : vector<2x32xf32>
    %319 = arith.negf %318 : vector<2x32xf32>
    %320 = math.exp %319 : vector<2x32xf32>
    %cst_67 = arith.constant 1.000000e+00 : f32
    %321 = vector.broadcast %cst_67 : f32 to vector<2x32xf32>
    %322 = arith.addf %321, %320 : vector<2x32xf32>
    %323 = arith.divf %321, %322 : vector<2x32xf32>
    %324 = vector.extract_strided_slice %304 {offsets = [0, 64], sizes = [2, 32], strides = [1, 1]} : vector<2x96xf32> to vector<2x32xf32>
    %325 = vector.extract_strided_slice %307 {offsets = [0, 64], sizes = [2, 32], strides = [1, 1]} : vector<2x96xf32> to vector<2x32xf32>
    %326 = arith.mulf %315, %325 : vector<2x32xf32>
    %327 = arith.addf %324, %326 : vector<2x32xf32>
    %328 = math.tanh %327 : vector<2x32xf32>
    %cst_68 = arith.constant 1.000000e+00 : f32
    %329 = vector.broadcast %cst_68 : f32 to vector<2x32xf32>
    %330 = arith.subf %329, %323 : vector<2x32xf32>
    %331 = arith.mulf %330, %328 : vector<2x32xf32>
    %332 = arith.mulf %323, %271 : vector<2x32xf32>
    %333 = arith.addf %331, %332 : vector<2x32xf32>
    %334 = vector.extract_strided_slice %21 {offsets = [10, 0], sizes = [2, 96], strides = [1, 1]} : vector<16x96xf32> to vector<2x96xf32>
    %cst_69 = arith.constant dense<0.000000e+00> : vector<2x96xf32>
    %335 = tpu.matmul %301, %12, %cst_69 {dimension_numbers = #tpu.dot_dimension_numbers<[1], [0], [0], [1], [0, 0, 1, 1], [], []>} : vector<2x32xf32>, vector<32x96xf32>, vector<2x96xf32> -> vector<2x96xf32>
    %336 = vector.broadcast %14 : vector<1x96xf32> to vector<2x96xf32>
    %337 = arith.addf %335, %336 : vector<2x96xf32>
    %338 = vector.extract_strided_slice %334 {offsets = [0, 0], sizes = [2, 32], strides = [1, 1]} : vector<2x96xf32> to vector<2x32xf32>
    %339 = vector.extract_strided_slice %337 {offsets = [0, 0], sizes = [2, 32], strides = [1, 1]} : vector<2x96xf32> to vector<2x32xf32>
    %340 = arith.addf %338, %339 : vector<2x32xf32>
    %341 = arith.negf %340 : vector<2x32xf32>
    %342 = math.exp %341 : vector<2x32xf32>
    %cst_70 = arith.constant 1.000000e+00 : f32
    %343 = vector.broadcast %cst_70 : f32 to vector<2x32xf32>
    %344 = arith.addf %343, %342 : vector<2x32xf32>
    %345 = arith.divf %343, %344 : vector<2x32xf32>
    %346 = vector.extract_strided_slice %334 {offsets = [0, 32], sizes = [2, 32], strides = [1, 1]} : vector<2x96xf32> to vector<2x32xf32>
    %347 = vector.extract_strided_slice %337 {offsets = [0, 32], sizes = [2, 32], strides = [1, 1]} : vector<2x96xf32> to vector<2x32xf32>
    %348 = arith.addf %346, %347 : vector<2x32xf32>
    %349 = arith.negf %348 : vector<2x32xf32>
    %350 = math.exp %349 : vector<2x32xf32>
    %cst_71 = arith.constant 1.000000e+00 : f32
    %351 = vector.broadcast %cst_71 : f32 to vector<2x32xf32>
    %352 = arith.addf %351, %350 : vector<2x32xf32>
    %353 = arith.divf %351, %352 : vector<2x32xf32>
    %354 = vector.extract_strided_slice %334 {offsets = [0, 64], sizes = [2, 32], strides = [1, 1]} : vector<2x96xf32> to vector<2x32xf32>
    %355 = vector.extract_strided_slice %337 {offsets = [0, 64], sizes = [2, 32], strides = [1, 1]} : vector<2x96xf32> to vector<2x32xf32>
    %356 = arith.mulf %345, %355 : vector<2x32xf32>
    %357 = arith.addf %354, %356 : vector<2x32xf32>
    %358 = math.tanh %357 : vector<2x32xf32>
    %cst_72 = arith.constant 1.000000e+00 : f32
    %359 = vector.broadcast %cst_72 : f32 to vector<2x32xf32>
    %360 = arith.subf %359, %353 : vector<2x32xf32>
    %361 = arith.mulf %360, %358 : vector<2x32xf32>
    %362 = arith.mulf %353, %301 : vector<2x32xf32>
    %363 = arith.addf %361, %362 : vector<2x32xf32>
    %cst_73 = arith.constant dense<0.000000e+00> : vector<2x96xf32>
    %364 = tpu.matmul %363, %15, %cst_73 {dimension_numbers = #tpu.dot_dimension_numbers<[1], [0], [0], [1], [0, 0, 1, 1], [], []>} : vector<2x32xf32>, vector<32x96xf32>, vector<2x96xf32> -> vector<2x96xf32>
    %365 = vector.broadcast %17 : vector<1x96xf32> to vector<2x96xf32>
    %366 = arith.addf %364, %365 : vector<2x96xf32>
    %cst_74 = arith.constant dense<0.000000e+00> : vector<2x96xf32>
    %367 = tpu.matmul %333, %16, %cst_74 {dimension_numbers = #tpu.dot_dimension_numbers<[1], [0], [0], [1], [0, 0, 1, 1], [], []>} : vector<2x32xf32>, vector<32x96xf32>, vector<2x96xf32> -> vector<2x96xf32>
    %368 = vector.broadcast %18 : vector<1x96xf32> to vector<2x96xf32>
    %369 = arith.addf %367, %368 : vector<2x96xf32>
    %370 = vector.extract_strided_slice %366 {offsets = [0, 0], sizes = [2, 32], strides = [1, 1]} : vector<2x96xf32> to vector<2x32xf32>
    %371 = vector.extract_strided_slice %369 {offsets = [0, 0], sizes = [2, 32], strides = [1, 1]} : vector<2x96xf32> to vector<2x32xf32>
    %372 = arith.addf %370, %371 : vector<2x32xf32>
    %373 = arith.negf %372 : vector<2x32xf32>
    %374 = math.exp %373 : vector<2x32xf32>
    %cst_75 = arith.constant 1.000000e+00 : f32
    %375 = vector.broadcast %cst_75 : f32 to vector<2x32xf32>
    %376 = arith.addf %375, %374 : vector<2x32xf32>
    %377 = arith.divf %375, %376 : vector<2x32xf32>
    %378 = vector.extract_strided_slice %366 {offsets = [0, 32], sizes = [2, 32], strides = [1, 1]} : vector<2x96xf32> to vector<2x32xf32>
    %379 = vector.extract_strided_slice %369 {offsets = [0, 32], sizes = [2, 32], strides = [1, 1]} : vector<2x96xf32> to vector<2x32xf32>
    %380 = arith.addf %378, %379 : vector<2x32xf32>
    %381 = arith.negf %380 : vector<2x32xf32>
    %382 = math.exp %381 : vector<2x32xf32>
    %cst_76 = arith.constant 1.000000e+00 : f32
    %383 = vector.broadcast %cst_76 : f32 to vector<2x32xf32>
    %384 = arith.addf %383, %382 : vector<2x32xf32>
    %385 = arith.divf %383, %384 : vector<2x32xf32>
    %386 = vector.extract_strided_slice %366 {offsets = [0, 64], sizes = [2, 32], strides = [1, 1]} : vector<2x96xf32> to vector<2x32xf32>
    %387 = vector.extract_strided_slice %369 {offsets = [0, 64], sizes = [2, 32], strides = [1, 1]} : vector<2x96xf32> to vector<2x32xf32>
    %388 = arith.mulf %377, %387 : vector<2x32xf32>
    %389 = arith.addf %386, %388 : vector<2x32xf32>
    %390 = math.tanh %389 : vector<2x32xf32>
    %cst_77 = arith.constant 1.000000e+00 : f32
    %391 = vector.broadcast %cst_77 : f32 to vector<2x32xf32>
    %392 = arith.subf %391, %385 : vector<2x32xf32>
    %393 = arith.mulf %392, %390 : vector<2x32xf32>
    %394 = arith.mulf %385, %333 : vector<2x32xf32>
    %395 = arith.addf %393, %394 : vector<2x32xf32>
    %396 = vector.extract_strided_slice %21 {offsets = [12, 0], sizes = [2, 96], strides = [1, 1]} : vector<16x96xf32> to vector<2x96xf32>
    %cst_78 = arith.constant dense<0.000000e+00> : vector<2x96xf32>
    %397 = tpu.matmul %363, %12, %cst_78 {dimension_numbers = #tpu.dot_dimension_numbers<[1], [0], [0], [1], [0, 0, 1, 1], [], []>} : vector<2x32xf32>, vector<32x96xf32>, vector<2x96xf32> -> vector<2x96xf32>
    %398 = vector.broadcast %14 : vector<1x96xf32> to vector<2x96xf32>
    %399 = arith.addf %397, %398 : vector<2x96xf32>
    %400 = vector.extract_strided_slice %396 {offsets = [0, 0], sizes = [2, 32], strides = [1, 1]} : vector<2x96xf32> to vector<2x32xf32>
    %401 = vector.extract_strided_slice %399 {offsets = [0, 0], sizes = [2, 32], strides = [1, 1]} : vector<2x96xf32> to vector<2x32xf32>
    %402 = arith.addf %400, %401 : vector<2x32xf32>
    %403 = arith.negf %402 : vector<2x32xf32>
    %404 = math.exp %403 : vector<2x32xf32>
    %cst_79 = arith.constant 1.000000e+00 : f32
    %405 = vector.broadcast %cst_79 : f32 to vector<2x32xf32>
    %406 = arith.addf %405, %404 : vector<2x32xf32>
    %407 = arith.divf %405, %406 : vector<2x32xf32>
    %408 = vector.extract_strided_slice %396 {offsets = [0, 32], sizes = [2, 32], strides = [1, 1]} : vector<2x96xf32> to vector<2x32xf32>
    %409 = vector.extract_strided_slice %399 {offsets = [0, 32], sizes = [2, 32], strides = [1, 1]} : vector<2x96xf32> to vector<2x32xf32>
    %410 = arith.addf %408, %409 : vector<2x32xf32>
    %411 = arith.negf %410 : vector<2x32xf32>
    %412 = math.exp %411 : vector<2x32xf32>
    %cst_80 = arith.constant 1.000000e+00 : f32
    %413 = vector.broadcast %cst_80 : f32 to vector<2x32xf32>
    %414 = arith.addf %413, %412 : vector<2x32xf32>
    %415 = arith.divf %413, %414 : vector<2x32xf32>
    %416 = vector.extract_strided_slice %396 {offsets = [0, 64], sizes = [2, 32], strides = [1, 1]} : vector<2x96xf32> to vector<2x32xf32>
    %417 = vector.extract_strided_slice %399 {offsets = [0, 64], sizes = [2, 32], strides = [1, 1]} : vector<2x96xf32> to vector<2x32xf32>
    %418 = arith.mulf %407, %417 : vector<2x32xf32>
    %419 = arith.addf %416, %418 : vector<2x32xf32>
    %420 = math.tanh %419 : vector<2x32xf32>
    %cst_81 = arith.constant 1.000000e+00 : f32
    %421 = vector.broadcast %cst_81 : f32 to vector<2x32xf32>
    %422 = arith.subf %421, %415 : vector<2x32xf32>
    %423 = arith.mulf %422, %420 : vector<2x32xf32>
    %424 = arith.mulf %415, %363 : vector<2x32xf32>
    %425 = arith.addf %423, %424 : vector<2x32xf32>
    %cst_82 = arith.constant dense<0.000000e+00> : vector<2x96xf32>
    %426 = tpu.matmul %425, %15, %cst_82 {dimension_numbers = #tpu.dot_dimension_numbers<[1], [0], [0], [1], [0, 0, 1, 1], [], []>} : vector<2x32xf32>, vector<32x96xf32>, vector<2x96xf32> -> vector<2x96xf32>
    %427 = vector.broadcast %17 : vector<1x96xf32> to vector<2x96xf32>
    %428 = arith.addf %426, %427 : vector<2x96xf32>
    %cst_83 = arith.constant dense<0.000000e+00> : vector<2x96xf32>
    %429 = tpu.matmul %395, %16, %cst_83 {dimension_numbers = #tpu.dot_dimension_numbers<[1], [0], [0], [1], [0, 0, 1, 1], [], []>} : vector<2x32xf32>, vector<32x96xf32>, vector<2x96xf32> -> vector<2x96xf32>
    %430 = vector.broadcast %18 : vector<1x96xf32> to vector<2x96xf32>
    %431 = arith.addf %429, %430 : vector<2x96xf32>
    %432 = vector.extract_strided_slice %428 {offsets = [0, 0], sizes = [2, 32], strides = [1, 1]} : vector<2x96xf32> to vector<2x32xf32>
    %433 = vector.extract_strided_slice %431 {offsets = [0, 0], sizes = [2, 32], strides = [1, 1]} : vector<2x96xf32> to vector<2x32xf32>
    %434 = arith.addf %432, %433 : vector<2x32xf32>
    %435 = arith.negf %434 : vector<2x32xf32>
    %436 = math.exp %435 : vector<2x32xf32>
    %cst_84 = arith.constant 1.000000e+00 : f32
    %437 = vector.broadcast %cst_84 : f32 to vector<2x32xf32>
    %438 = arith.addf %437, %436 : vector<2x32xf32>
    %439 = arith.divf %437, %438 : vector<2x32xf32>
    %440 = vector.extract_strided_slice %428 {offsets = [0, 32], sizes = [2, 32], strides = [1, 1]} : vector<2x96xf32> to vector<2x32xf32>
    %441 = vector.extract_strided_slice %431 {offsets = [0, 32], sizes = [2, 32], strides = [1, 1]} : vector<2x96xf32> to vector<2x32xf32>
    %442 = arith.addf %440, %441 : vector<2x32xf32>
    %443 = arith.negf %442 : vector<2x32xf32>
    %444 = math.exp %443 : vector<2x32xf32>
    %cst_85 = arith.constant 1.000000e+00 : f32
    %445 = vector.broadcast %cst_85 : f32 to vector<2x32xf32>
    %446 = arith.addf %445, %444 : vector<2x32xf32>
    %447 = arith.divf %445, %446 : vector<2x32xf32>
    %448 = vector.extract_strided_slice %428 {offsets = [0, 64], sizes = [2, 32], strides = [1, 1]} : vector<2x96xf32> to vector<2x32xf32>
    %449 = vector.extract_strided_slice %431 {offsets = [0, 64], sizes = [2, 32], strides = [1, 1]} : vector<2x96xf32> to vector<2x32xf32>
    %450 = arith.mulf %439, %449 : vector<2x32xf32>
    %451 = arith.addf %448, %450 : vector<2x32xf32>
    %452 = math.tanh %451 : vector<2x32xf32>
    %cst_86 = arith.constant 1.000000e+00 : f32
    %453 = vector.broadcast %cst_86 : f32 to vector<2x32xf32>
    %454 = arith.subf %453, %447 : vector<2x32xf32>
    %455 = arith.mulf %454, %452 : vector<2x32xf32>
    %456 = arith.mulf %447, %395 : vector<2x32xf32>
    %457 = arith.addf %455, %456 : vector<2x32xf32>
    %458 = vector.extract_strided_slice %21 {offsets = [14, 0], sizes = [2, 96], strides = [1, 1]} : vector<16x96xf32> to vector<2x96xf32>
    %cst_87 = arith.constant dense<0.000000e+00> : vector<2x96xf32>
    %459 = tpu.matmul %425, %12, %cst_87 {dimension_numbers = #tpu.dot_dimension_numbers<[1], [0], [0], [1], [0, 0, 1, 1], [], []>} : vector<2x32xf32>, vector<32x96xf32>, vector<2x96xf32> -> vector<2x96xf32>
    %460 = vector.broadcast %14 : vector<1x96xf32> to vector<2x96xf32>
    %461 = arith.addf %459, %460 : vector<2x96xf32>
    %462 = vector.extract_strided_slice %458 {offsets = [0, 0], sizes = [2, 32], strides = [1, 1]} : vector<2x96xf32> to vector<2x32xf32>
    %463 = vector.extract_strided_slice %461 {offsets = [0, 0], sizes = [2, 32], strides = [1, 1]} : vector<2x96xf32> to vector<2x32xf32>
    %464 = arith.addf %462, %463 : vector<2x32xf32>
    %465 = arith.negf %464 : vector<2x32xf32>
    %466 = math.exp %465 : vector<2x32xf32>
    %cst_88 = arith.constant 1.000000e+00 : f32
    %467 = vector.broadcast %cst_88 : f32 to vector<2x32xf32>
    %468 = arith.addf %467, %466 : vector<2x32xf32>
    %469 = arith.divf %467, %468 : vector<2x32xf32>
    %470 = vector.extract_strided_slice %458 {offsets = [0, 32], sizes = [2, 32], strides = [1, 1]} : vector<2x96xf32> to vector<2x32xf32>
    %471 = vector.extract_strided_slice %461 {offsets = [0, 32], sizes = [2, 32], strides = [1, 1]} : vector<2x96xf32> to vector<2x32xf32>
    %472 = arith.addf %470, %471 : vector<2x32xf32>
    %473 = arith.negf %472 : vector<2x32xf32>
    %474 = math.exp %473 : vector<2x32xf32>
    %cst_89 = arith.constant 1.000000e+00 : f32
    %475 = vector.broadcast %cst_89 : f32 to vector<2x32xf32>
    %476 = arith.addf %475, %474 : vector<2x32xf32>
    %477 = arith.divf %475, %476 : vector<2x32xf32>
    %478 = vector.extract_strided_slice %458 {offsets = [0, 64], sizes = [2, 32], strides = [1, 1]} : vector<2x96xf32> to vector<2x32xf32>
    %479 = vector.extract_strided_slice %461 {offsets = [0, 64], sizes = [2, 32], strides = [1, 1]} : vector<2x96xf32> to vector<2x32xf32>
    %480 = arith.mulf %469, %479 : vector<2x32xf32>
    %481 = arith.addf %478, %480 : vector<2x32xf32>
    %482 = math.tanh %481 : vector<2x32xf32>
    %cst_90 = arith.constant 1.000000e+00 : f32
    %483 = vector.broadcast %cst_90 : f32 to vector<2x32xf32>
    %484 = arith.subf %483, %477 : vector<2x32xf32>
    %485 = arith.mulf %484, %482 : vector<2x32xf32>
    %486 = arith.mulf %477, %425 : vector<2x32xf32>
    %487 = arith.addf %485, %486 : vector<2x32xf32>
    %cst_91 = arith.constant dense<0.000000e+00> : vector<2x96xf32>
    %488 = tpu.matmul %487, %15, %cst_91 {dimension_numbers = #tpu.dot_dimension_numbers<[1], [0], [0], [1], [0, 0, 1, 1], [], []>} : vector<2x32xf32>, vector<32x96xf32>, vector<2x96xf32> -> vector<2x96xf32>
    %489 = vector.broadcast %17 : vector<1x96xf32> to vector<2x96xf32>
    %490 = arith.addf %488, %489 : vector<2x96xf32>
    %cst_92 = arith.constant dense<0.000000e+00> : vector<2x96xf32>
    %491 = tpu.matmul %457, %16, %cst_92 {dimension_numbers = #tpu.dot_dimension_numbers<[1], [0], [0], [1], [0, 0, 1, 1], [], []>} : vector<2x32xf32>, vector<32x96xf32>, vector<2x96xf32> -> vector<2x96xf32>
    %492 = vector.broadcast %18 : vector<1x96xf32> to vector<2x96xf32>
    %493 = arith.addf %491, %492 : vector<2x96xf32>
    %494 = vector.extract_strided_slice %490 {offsets = [0, 0], sizes = [2, 32], strides = [1, 1]} : vector<2x96xf32> to vector<2x32xf32>
    %495 = vector.extract_strided_slice %493 {offsets = [0, 0], sizes = [2, 32], strides = [1, 1]} : vector<2x96xf32> to vector<2x32xf32>
    %496 = arith.addf %494, %495 : vector<2x32xf32>
    %497 = arith.negf %496 : vector<2x32xf32>
    %498 = math.exp %497 : vector<2x32xf32>
    %cst_93 = arith.constant 1.000000e+00 : f32
    %499 = vector.broadcast %cst_93 : f32 to vector<2x32xf32>
    %500 = arith.addf %499, %498 : vector<2x32xf32>
    %501 = arith.divf %499, %500 : vector<2x32xf32>
    %502 = vector.extract_strided_slice %490 {offsets = [0, 32], sizes = [2, 32], strides = [1, 1]} : vector<2x96xf32> to vector<2x32xf32>
    %503 = vector.extract_strided_slice %493 {offsets = [0, 32], sizes = [2, 32], strides = [1, 1]} : vector<2x96xf32> to vector<2x32xf32>
    %504 = arith.addf %502, %503 : vector<2x32xf32>
    %505 = arith.negf %504 : vector<2x32xf32>
    %506 = math.exp %505 : vector<2x32xf32>
    %cst_94 = arith.constant 1.000000e+00 : f32
    %507 = vector.broadcast %cst_94 : f32 to vector<2x32xf32>
    %508 = arith.addf %507, %506 : vector<2x32xf32>
    %509 = arith.divf %507, %508 : vector<2x32xf32>
    %510 = vector.extract_strided_slice %490 {offsets = [0, 64], sizes = [2, 32], strides = [1, 1]} : vector<2x96xf32> to vector<2x32xf32>
    %511 = vector.extract_strided_slice %493 {offsets = [0, 64], sizes = [2, 32], strides = [1, 1]} : vector<2x96xf32> to vector<2x32xf32>
    %512 = arith.mulf %501, %511 : vector<2x32xf32>
    %513 = arith.addf %510, %512 : vector<2x32xf32>
    %514 = math.tanh %513 : vector<2x32xf32>
    %cst_95 = arith.constant 1.000000e+00 : f32
    %515 = vector.broadcast %cst_95 : f32 to vector<2x32xf32>
    %516 = arith.subf %515, %509 : vector<2x32xf32>
    %517 = arith.mulf %516, %514 : vector<2x32xf32>
    %518 = arith.mulf %509, %457 : vector<2x32xf32>
    %519 = arith.addf %517, %518 : vector<2x32xf32>
    %520 = tpu.concatenate %85, %147, %209, %271, %333, %395, %457, %519 in 0 : vector<2x32xf32>, vector<2x32xf32>, vector<2x32xf32>, vector<2x32xf32>, vector<2x32xf32>, vector<2x32xf32>, vector<2x32xf32>, vector<2x32xf32> -> vector<16x32xf32>
    %c0_96 = arith.constant 0 : index
    %c0_97 = arith.constant 0 : index
    %521 = vector.load %arg13[%c0_96, %c0_97] : memref<32x32xf32, #tpu.memory_space<vmem>>, vector<32x32xf32>
    %cst_98 = arith.constant dense<0.000000e+00> : vector<16x32xf32>
    %522 = tpu.matmul %520, %521, %cst_98 {dimension_numbers = #tpu.dot_dimension_numbers<[1], [0], [0], [1], [0, 0, 1, 1], [], []>} : vector<16x32xf32>, vector<32x32xf32>, vector<16x32xf32> -> vector<16x32xf32>
    %c0_99 = arith.constant 0 : index
    %c0_100 = arith.constant 0 : index
    %523 = vector.load %arg14[%c0_99, %c0_100] : memref<1x32xf32, #tpu.memory_space<vmem>>, vector<1x32xf32>
    %524 = vector.broadcast %523 : vector<1x32xf32> to vector<16x32xf32>
    %525 = arith.addf %522, %524 : vector<16x32xf32>
    %cst_101 = arith.constant 0.000000e+00 : f32
    %526 = vector.broadcast %cst_101 : f32 to vector<16x32xf32>
    %527 = arith.maximumf %525, %526 : vector<16x32xf32>
    %c0_102 = arith.constant 0 : index
    %c0_103 = arith.constant 0 : index
    %528 = vector.load %arg15[%c0_102, %c0_103] : memref<32x12xf32, #tpu.memory_space<vmem>>, vector<32x12xf32>
    %cst_104 = arith.constant dense<0.000000e+00> : vector<16x12xf32>
    %529 = tpu.matmul %527, %528, %cst_104 {dimension_numbers = #tpu.dot_dimension_numbers<[1], [0], [0], [1], [0, 0, 1, 1], [], []>} : vector<16x32xf32>, vector<32x12xf32>, vector<16x12xf32> -> vector<16x12xf32>
    %c0_105 = arith.constant 0 : index
    %c0_106 = arith.constant 0 : index
    %530 = vector.load %arg16[%c0_105, %c0_106] : memref<1x12xf32, #tpu.memory_space<vmem>>, vector<1x12xf32>
    %531 = vector.broadcast %530 : vector<1x12xf32> to vector<16x12xf32>
    %532 = arith.addf %529, %531 : vector<16x12xf32>
    %cst_107 = arith.constant dense<0xFF800000> : vector<16xf32>
    %533 = vector.multi_reduction <maximumf>, %532, %cst_107 [1] : vector<16x12xf32> to vector<16xf32>
    %534 = vector.shape_cast %533 : vector<16xf32> to vector<16x1xf32>
    %535 = vector.broadcast %534 : vector<16x1xf32> to vector<16x12xf32>
    %536 = arith.cmpf oeq, %532, %535 : vector<16x12xf32>
    %c12_i32 = arith.constant 12 : i32
    %537 = vector.broadcast %c12_i32 : i32 to vector<16x12xi32>
    %538 = arith.select %536, %0, %537 : vector<16x12xi1>, vector<16x12xi32>
    %cst_108 = arith.constant dense<2147483647> : vector<16xi32>
    %539 = vector.multi_reduction <minsi>, %538, %cst_108 [1] : vector<16x12xi32> to vector<16xi32>
    %540 = vector.shape_cast %539 : vector<16xi32> to vector<16x1xi32>
    %c0_109 = arith.constant 0 : index
    %c0_110 = arith.constant 0 : index
    %541 = vector.load %arg17[%c0_109, %c0_110] : memref<16x1xi32, #tpu.memory_space<vmem>>, vector<16x1xi32>
    tpu.vector_store %arg17[%c0_109, %c0_110], %540 {strides = array<i32>} : memref<16x1xi32, #tpu.memory_space<vmem>>, vector<16x1xi32>,
    %542 = vector.broadcast %534 : vector<16x1xf32> to vector<16x12xf32>
    %543 = arith.subf %532, %542 : vector<16x12xf32>
    %544 = math.exp %543 : vector<16x12xf32>
    %cst_111 = arith.constant dense<0.000000e+00> : vector<16xf32>
    %545 = vector.multi_reduction <add>, %544, %cst_111 [1] : vector<16x12xf32> to vector<16xf32>
    %546 = vector.shape_cast %545 : vector<16xf32> to vector<16x1xf32>
    %547 = math.log %546 : vector<16x1xf32>
    %548 = arith.addf %534, %547 : vector<16x1xf32>
    %c0_112 = arith.constant 0 : index
    %c0_113 = arith.constant 0 : index
    %549 = vector.load %arg0[%c0_112, %c0_113] : memref<16x1xi32, #tpu.memory_space<vmem>>, vector<16x1xi32>
    %550 = vector.broadcast %549 : vector<16x1xi32> to vector<16x12xi32>
    %551 = arith.cmpi eq, %550, %0 : vector<16x12xi32>
    %cst_114 = arith.constant 0.000000e+00 : f32
    %552 = vector.broadcast %cst_114 : f32 to vector<16x12xf32>
    %553 = arith.select %551, %532, %552 : vector<16x12xi1>, vector<16x12xf32>
    %cst_115 = arith.constant dense<0.000000e+00> : vector<16xf32>
    %554 = vector.multi_reduction <add>, %553, %cst_115 [1] : vector<16x12xf32> to vector<16xf32>
    %555 = vector.shape_cast %554 : vector<16xf32> to vector<16x1xf32>
    %556 = arith.subf %548, %555 : vector<16x1xf32>
    %c0_116 = arith.constant 0 : index
    %c0_117 = arith.constant 0 : index
    %557 = vector.load %arg2[%c0_116, %c0_117] : memref<16x1xf32, #tpu.memory_space<vmem>>, vector<16x1xf32>
    %558 = arith.mulf %556, %557 : vector<16x1xf32>
    %cst_118 = arith.constant dense<0.000000e+00> : vector<1xf32>
    %559 = vector.multi_reduction <add>, %558, %cst_118 [0] : vector<16x1xf32> to vector<1xf32>
    %560 = vector.shape_cast %559 : vector<1xf32> to vector<1x1xf32>
    %cst_119 = arith.constant dense<0.000000e+00> : vector<1xf32>
    %561 = vector.multi_reduction <add>, %557, %cst_119 [0] : vector<16x1xf32> to vector<1xf32>
    %562 = vector.shape_cast %561 : vector<1xf32> to vector<1x1xf32>
    %563 = arith.divf %560, %562 : vector<1x1xf32>
    %c0_120 = arith.constant 0 : index
    %c0_121 = arith.constant 0 : index
    %564 = vector.load %arg18[%c0_120, %c0_121] : memref<1x1xf32, #tpu.memory_space<vmem>>, vector<1x1xf32>
    tpu.vector_store %arg18[%c0_120, %c0_121], %563 {strides = array<i32>} : memref<1x1xf32, #tpu.memory_space<vmem>>, vector<1x1xf32>,
    return
  }
}

</mosaic_0001>

<bundles_post_ra>
// kernel: rnn_decoder_forward.1
= control target key start
LH: loop header
LB: loop body
LE: loop exit
PB: predicated region body
PF: predicated region fallthrough
CT: control target
= control target key end

     0   :  { %s2586_s0 = inlined_call_operand.vmem [shape: s32[16,1], index: 0, kind: input, shape index: {}]   ;;  %s2587_s1 = inlined_call_operand.vmem [shape: s32[16,1], index: 1, kind: input, shape index: {}]   ;;  %s2588_s2 = inlined_call_operand.vmem [shape: f32[16,1], index: 2, kind: input, shape index: {}]   ;;  %s2589_s3 = inlined_call_operand.vmem [shape: f32[2,16], index: 3, kind: input, shape index: {}]   ;;  %s2590_s4 = inlined_call_operand.vmem [shape: f32[12,16], index: 4, kind: input, shape index: {}]   ;;  %s2591_s5 = inlined_call_operand.hbm [shape: f32[16,96], index: 5, kind: input, shape index: {}]   ;;  %s2592_s6 = inlined_call_operand.vmem [shape: f32[32,96], index: 6, kind: input, shape index: {}]   ;;  %s2593_s7 = inlined_call_operand.vmem [shape: f32[1,96], index: 7, kind: input, shape index: {}]   ;;  %s2594_s8 = inlined_call_operand.vmem [shape: f32[1,96], index: 8, kind: input, shape index: {}]   ;;  %s2595_s9 = inlined_call_operand.vmem [shape: f32[32,96], index: 9, kind: input, shape index: {}]   ;;  %s2596_s10 = inlined_call_operand.vmem [shape: f32[32,96], index: 10, kind: input, shape index: {}]   ;;  %s2597_s11 = inlined_call_operand.vmem [shape: f32[1,96], index: 11, kind: input, shape index: {}]   ;;  %s2598_s12 = inlined_call_operand.vmem [shape: f32[1,96], index: 12, kind: input, shape index: {}]   ;;  %s2599_s13 = inlined_call_operand.vmem [shape: f32[32,32], index: 13, kind: input, shape index: {}]   ;;  %s2600_s14 = inlined_call_operand.hbm [shape: f32[1,32], index: 14, kind: input, shape index: {}]   ;;  %s2601_s15 = inlined_call_operand.vmem [shape: f32[32,12], index: 15, kind: input, shape index: {}]   ;;  %s2602_s16 = inlined_call_operand.hbm [shape: f32[1,12], index: 16, kind: input, shape index: {}]   ;;  %s2603_s17 = inlined_call_operand.vmem [shape: s32[16,1], index: 17, kind: output, shape index: {0}]   ;;  %s2604_s18 = inlined_call_operand.hbm [shape: f32[1,1], index: 18, kind: output, shape index: {1}]  }
   0x1   :  { %2608 = sst [smem:[#allocation12_spill]] %s2586_s0 }
   0x2   :  { %2609 = sst [smem:[#allocation13_spill]] %s2587_s1 }
   0x3   :  { %2610 = sst [smem:[#allocation14_spill]] %s2588_s2 }
   0x4   :  { %24 = vsyncpa [#allocation3], 0 }
   0x5   :  { %25 = vsyncpa [#allocation6], 0  ;;  %s71_s29 = sshll.u32 %s2600_s14, 4  ;;  %s72_s29 = int_to_ptr.hbm [resolvable:$true] %s71_s29 }
   0x6   :  { %26 = vsyncpa [#allocation4], 0  ;;  %s1967_s30 = smov [#allocation5]   ;;  %s41_s20 = sshll.u32 %s2591_s5, 4  ;;  %s42_s20 = int_to_ptr.hbm [resolvable:$true] %s41_s20 }
   0x7   :  { %s73_s0 = sshll.u32 %s1967_s30, 4  ;;  %s1968_s21 = smov [#allocation2]   ;;  %s74_s0 = int_to_ptr.vmem [resolvable:$true] %s73_s0 }
   0x8   :  { %76 = dma.hbm_to_vmem [thread:$0]  %s72_s29, 16, %s74_s0, [#allocation6]  }
   0x9   :  { %s43_s22 = sshll.u32 %s1968_s21, 4  ;;  %s1969_s2 = smov 128   ;;  %s44_s22 = int_to_ptr.vmem [resolvable:$true] %s43_s22 }
   0xa   :  { %s1970_s23 = smov 8   ;;  %s84_s14 = sshll.u32 %s2602_s16, 4  ;;  %s85_s14 = int_to_ptr.hbm [resolvable:$true] %s84_s14 }
   0xb   :  { %49 = dma.hbm_to_vmem [thread:$0]  %s42_s20, 256, %s44_s22, [#allocation3], %s1969_s2, %s1969_s2, %s1970_s23  }
   0xc   :  { %s1971_s26 = smov [#allocation7]  }
   0xd   :  { %s86_s27 = sshll.u32 %s1971_s26, 4  ;;  %s87_s27 = int_to_ptr.vmem [resolvable:$true] %s86_s27 }
   0xe   :  { %89 = dma.hbm_to_vmem [thread:$0]  %s85_s14, 16, %s87_s27, [#allocation6]  }
   0xf   :  { %1961 = dma.done.wait [#allocation3], 256  }
  0x10   :  { %1962 = vsyncadd [#allocation3], 4294967040 }
  0x11   :  { %1963 = dma.done.wait [#allocation6], 32  }
  0x12   :  { %1964 = vsyncadd [#allocation6], 4294967264  ;;  %v1972_v0 = vmov 0   ;;  %vm130_vm0 = vcmask 1043456   ;;  %s2611_s29 = sld [smem:[#allocation13_spill]]  ;;  %v118_v4 = vld [vmem:[%s2590_s4] sm:$0xff]  ;;  %v102_v9 = vlaneseq }
  0x13   :  { %1745 = vset.pattern.permute.xlu0 %v1972_v0  ;;  %v119_v2 = vld [vmem:[%s2590_s4 + $0x8] sm:$0xf]  ;;  %v2098_v5 = vld [vmem:[%s2592_s6 + $0x18] sm:$0xff]  ;;  %v2103_v6 = vld [vmem:[%s2592_s6 + $0x10] sm:$0xff]  ;;  %vm134_vm1 = vcmask 97280   ;;  %v1973_v12 = vmov 0.0  }
  0x14   :  { %1684 = vmatpush.msk.msra.mxu0 %vm130_vm0, %v119_v2  ;;  %1731 = vmatpush.msk.msra.mxu2 %vm130_vm0, %v119_v2  ;;  %v2109_v7 = vld [vmem:[%s2592_s6 + $0x8] sm:$0xff]  ;;  %v2115_v8 = vld [vmem:[%s2592_s6] sm:$0xff]  ;;  %v2119_v10 = vand.u32 127, %v102_v9  ;;  %vm128_vm4 = vcmask 1041408   ;;  %vm132_vm5 = vcmask 1045504   ;;  %vm188_vm6 = vcmask 130048  }
  0x15   :  { %v168_v16 = vld [vmem:[#allocation2 + $0x8] sm:$0xff]  ;;  %v167_v17 = vld [vmem:[#allocation2] sm:$0xff]  ;;  %s1974_s28 = smov 64   ;;  %v2156_v54 = vld [vmem:[%s2596_s10 + $0x18] sm:$0xff]  ;;  %vm221_vm11 = vcmask 261120   ;;  %s2612_s1 = sld [smem:[#allocation12_spill]] }
  0x16   :  { %159 = vmatpush.msra.mxu0 %v118_v4  ;;  %1732 = vmatpush.msra.mxu2 %v118_v4  ;;  %v120_v18 = vld [vmem:[%s2589_s3] sm:$0x3]  ;;  %v2163_v55 = vld [vmem:[%s2596_s10 + $0x10] sm:$0xff]  ;;  %v2168_v56 = vld [vmem:[%s2596_s10 + $0x8] sm:$0xff]  ;;  %s1976_s25 = smov [#allocation8]   ;;  %s1669_s14 = sshll.u32 %s2604_s18, 4  ;;  %s1670_s14 = int_to_ptr.hbm [resolvable:$true] %s1669_s14 }
  0x17   :  { %209 = vmatpush.msra.mxu1 %v168_v16  ;;  %1733 = vmatpush.msra.mxu3 %v168_v16  ;;  %v122_v19 = vrot.slane %v120_v18, 6  ;;  %v124_v20 = vrot.slane %v120_v18, 4  ;;  %v126_v22 = vrot.slane %v120_v18, 2  ;;  %v2137_v29 = vld [vmem:[%s2594_s8] ss:$0 sm:$0xff]  ;;  %v2174_v57 = vld [vmem:[%s2595_s9 + $0x18] sm:$0xff] }
  0x18   :  { %v104_v1 = vld [vmem:[%s2611_s29] sm:$0xff]  ;;  %v105_v3 = vld [vmem:[%s2611_s29 + $0x8] sm:$0xff]  ;;  %237 = vmatpush.msrb.mxu2 %v2098_v5  ;;  %v2179_v58 = vld [vmem:[%s2595_s9 + $0x10] sm:$0xff]  ;;  %455 = vmatpush.msrb.mxu0 %v2174_v57 }
  0x19   :  { %107 = vperm.xlu0 %1745, %v104_v1   ;;  %210 = vmatpush.msra.mxu1 %v167_v17  ;;  %v129_v21 = vsel %vm128_vm4, %v120_v18, %v122_v19  ;;  %v2144_v32 = vld [vmem:[%s2593_s7] ss:$0 sm:$0xff]  ;;  %s1975_s7 = smov 96   ;;  %v2193_v60 = vld [vmem:[%s2595_s9 + $0x8] sm:$0xff] }
  0x1a   :  { %238 = vmatpush.msrb.mxu2 %v2103_v6  ;;  %1734 = vmatpush.msra.mxu3 %v167_v17  ;;  %v131_v23 = vsel %vm130_vm0, %v129_v21, %v124_v20  ;;  %v2185_v59 = vld [vmem:[%s2596_s10] sm:$0xff] }
  0x1b   :  { %v133_v24 = vsel %vm132_vm5, %v131_v23, %v126_v22  ;;  %480 = vmatpush.msrb.mxu1 %v2156_v54  ;;  %456 = vmatpush.msrb.mxu0 %v2179_v58  ;;  %v2202_v61 = vld [vmem:[%s2595_s9] sm:$0xff] }
  0x1c   :  { %239 = vmatpush.msrb.mxu2 %v2109_v7  ;;  %304 = vmatpush.msrb.mxu3 %v2174_v57  ;;  %v2244_v4 = vld [vmem:[%s2598_s12] ss:$0 sm:$0xff] }
  0x1d   :  { %481 = vmatpush.msrb.mxu1 %v2163_v55  ;;  %457 = vmatpush.msrb.mxu0 %v2193_v60 }
  0x1e   :  { %240 = vmatpush.msrb.mxu2 %v2115_v8  ;;  %305 = vmatpush.msrb.mxu3 %v2179_v58 }
  0x1f   :  { %482 = vmatpush.msrb.mxu1 %v2168_v56  ;;  %458 = vmatpush.msrb.mxu0 %v2202_v61 }
  0x20   :  { %306 = vmatpush.msrb.mxu3 %v2193_v60 }
  0x21   :  { %110 = vperm.xlu0 %1745, %v105_v3   ;;  %483 = vmatpush.msrb.mxu1 %v2185_v59 }
  0x22   :  { %307 = vmatpush.msrb.mxu3 %v2202_v61 }
  0x8b   :  { %v108_v11 = vpop.permute.xlu0 %107 }
  0x8c   :  { %vm112_vm2 = vcmp.eq.s32.totalorder %v108_v11, %v2119_v10 }
  0x8d   :  { %v1682_v13 = vsel %vm112_vm2, 1.0, %v1973_v12 }
  0x8e   :  { %1685 = vmatmul.msk.f32.vlgmr.msra.gmra.mxu0 %vm134_vm1, %v1682_v13  ;;  %v2256_v13 = vld [vmem:[%s2597_s11] ss:$0 sm:$0xff] }
  0x8f   :  { %633 = vmatpush.msra.mxu0 %v2156_v54 }
  0x91   :  { %634 = vmatpush.msra.mxu0 %v2163_v55 }
  0x93   :  { %v111_v14 = vpop.permute.xlu0 %110  ;;  %635 = vmatpush.msra.mxu0 %v2168_v56 }
  0x94   :  { %vm113_vm3 = vcmp.eq.s32.totalorder %v111_v14, %v2119_v10 }
  0x95   :  { %v1683_v15 = vsel %vm113_vm3, 1.0, %v1973_v12  ;;  %636 = vmatpush.msra.mxu0 %v2185_v59 }
  0x96   :  { %1686 = vmatmul.msk.f32.vlgmr.msra.gmra.mxu2 %vm134_vm1, %v1683_v15 }
  0x97   :  { %327 = vmatpush.msra.mxu2 %v2156_v54 }
  0x99   :  { %328 = vmatpush.msra.mxu2 %v2163_v55 }
  0x9b   :  { %329 = vmatpush.msra.mxu2 %v2168_v56 }
  0x9d   :  { %330 = vmatpush.msra.mxu2 %v2185_v59 }
  0x9e   :  { %241 = vmatmul.f32.vlgmr.msrb.gmra.mxu2 %v1973_v12 }
  0x9f   :  { %539 = vmatpush.msrb.mxu2 %v2098_v5 }
  0xa1   :  { %540 = vmatpush.msrb.mxu2 %v2103_v6 }
  0xa3   :  { %541 = vmatpush.msrb.mxu2 %v2109_v7 }
  0xa5   :  { %542 = vmatpush.msrb.mxu2 %v2115_v8 }
  0xa6   :  { %331 = vmatmul.f32.vlgmr.msra.gmra.mxu2 %v1973_v12 }
  0xa7   :  { %761 = vmatpush.msra.mxu2 %v2174_v57 }
  0xa9   :  { %762 = vmatpush.msra.mxu2 %v2179_v58 }
  0xab   :  { %763 = vmatpush.msra.mxu2 %v2193_v60 }
  0xad   :  { %764 = vmatpush.msra.mxu2 %v2202_v61 }
 0x10b   :  { %v161_v25 = vpop.f32.mrf.mxu0 }
 0x10c   :  { %v162_v26 = vadd.f32 %v161_v25, %v133_v24 }
 0x10e   :  { %1687 = vmatmul.msk.f32.vlgmr.msra.gmra.mxu1 %vm188_vm6, %v162_v26 }
 0x10f   :  { %692 = vmatpush.msra.mxu1 %v2098_v5 }
 0x111   :  { %693 = vmatpush.msra.mxu1 %v2103_v6 }
 0x113   :  { %694 = vmatpush.msra.mxu1 %v2109_v7 }
 0x115   :  { %695 = vmatpush.msra.mxu1 %v2115_v8 }
 0x119   :  { %v164_v27 = vpop.f32.mrf.mxu2 }
 0x11a   :  { %v165_v28 = vadd.f32 %v164_v27, %v133_v24 }
 0x11c   :  { %1688 = vmatmul.msk.f32.vlgmr.msra.gmra.mxu3 %vm188_vm6, %v165_v28 }
 0x11d   :  { %386 = vmatpush.msra.mxu3 %v2098_v5 }
 0x11f   :  { %387 = vmatpush.msra.mxu3 %v2103_v6 }
 0x121   :  { %v242_v30 = vpop.f32.mrf.mxu2  ;;  %388 = vmatpush.msra.mxu3 %v2109_v7 }
 0x122   :  { %v243_v31 = vadd.f32 %v2137_v29, %v242_v30 }
 0x123   :  { %389 = vmatpush.msra.mxu3 %v2115_v8 }
 0x124   :  { %266 = vrot.lane.b32.xlu1 %v243_v31, %s1974_s28 }
 0x129   :  { %v332_v9 = vpop.f32.mrf.mxu2 }
 0x12a   :  { %v333_v11 = vadd.f32 %v2244_v4, %v332_v9 }
 0x18b   :  { %v212_v33 = vpop.f32.mrf.mxu1 }
 0x18c   :  { %v2147_v34 = vadd.f32 %v2144_v32, %v212_v33 }
 0x18e   :  { %v245_v35 = vadd.f32 %v243_v31, %v2147_v34 }
 0x190   :  { %v1689_v36 = vmul.f32 -1.442695, %v245_v35 }
 0x192   :  { %1752 = vpow2.f32 %v1689_v36 }
 0x196   :  { %v267_v46 = vpop.permute.xlu1 %266 }
 0x198   :  { %v1753_v37 = vpop.eup %1752 }
 0x199   :  { %v249_v38 = vadd.f32 1.0, %v1753_v37 }
 0x19b   :  { %1754 = vrcp.f32 %v249_v38  ;;  %v261_v42 = vand.u32 2147483648, %v249_v38  ;;  %v259_v44 = vand.u32 2147483647, %v249_v38  ;;  %vm255_vm8 = vweird.f32 %v249_v38 }
 0x19d   :  { %v262_v47 = vor.u32 1.1754944e-38, %v261_v42  ;;  %vm260_vm10 = vcmp.eq.f32.partialorder %v259_v44, 8.507059e+37 }
 0x19f   :  { %v2251_v12 = vpop.f32.mrf.mxu3 }
 0x1a1   :  { %v1755_v39 = vpop.eup %1754 }
 0x1a2   :  { %v251_v40 = vmul.f32 %v1755_v39, %v249_v38  ;;  %vm256_vm7 = vweird.f32 %v1755_v39 }
 0x1a3   :  { %vm257_vm9 = vmor %vm255_vm8, %vm256_vm7 }
 0x1a4   :  { %v252_v41 = vsub.f32 1.0, %v251_v40 }
 0x1a6   :  { %v253_v43 = vmul.f32 %v1755_v39, %v252_v41 }
 0x1a8   :  { %v254_v45 = vadd.f32 %v1755_v39, %v253_v43 }
 0x1aa   :  { %v258_v48 = vsel %vm257_vm9, %v1755_v39, %v254_v45 }
 0x1ab   :  { %v263_v49 = vsel %vm260_vm10, %v262_v47, %v258_v48 }
 0x1ac   :  { %v269_v50 = vmul.f32 %v267_v46, %v263_v49  ;;  %v276_v62 = vsub.f32 1.0, %v263_v49  ;;  %v282_v0 = vmul.f32 0.0, %v263_v49 }
 0x1ae   :  { %271 = vrot.lane.b32.xlu1 %v269_v50, %s1974_s28 }
 0x1b6   :  { %356 = vrot.lane.b32.xlu1 %v333_v11, %s1974_s28 }
 0x220   :  { %v272_v51 = vpop.permute.xlu1 %271 }
 0x221   :  { %v274_v52 = vadd.f32 %v272_v51, %v2147_v34 }
 0x223   :  { %1756 = vtanh.f32 %v274_v52 }
 0x228   :  { %v357_v31 = vpop.permute.xlu1 %356 }
 0x229   :  { %v1757_v53 = vpop.eup %1756 }
 0x22a   :  { %278 = vrot.lane.b32.xlu2 %v1757_v53, %s1975_s7 }
 0x284   :  { %v279_v63 = vpop.permute.xlu2 %278 }
 0x285   :  { %v281_v1 = vmul.f32 %v279_v63, %v276_v62 }
 0x287   :  { %v2230_v2 = vadd.f32 %v282_v0, %v281_v1 }
 0x289   :  { %288 = vrot.lane.b32.xlu2 %v2230_v2, %s1975_s7 }
 0x2e3   :  { %v289_v3 = vpop.permute.xlu2 %288 }
 0x2e4   :  { %1690 = vmatmul.msk.f32.vlgmr.msrb.gmra.mxu3 %vm221_vm11, %v289_v3 }
 0x2e5   :  { %608 = vmatpush.msrb.mxu3 %v2174_v57 }
 0x2e7   :  { %609 = vmatpush.msrb.mxu3 %v2179_v58 }
 0x2e9   :  { %610 = vmatpush.msrb.mxu3 %v2193_v60 }
 0x2eb   :  { %611 = vmatpush.msrb.mxu3 %v2202_v61 }
 0x2ec   :  { %1692 = vmatmul.msk.f32.vlgmr.msra.gmra.mxu3 %vm221_vm11, %v289_v3 }
 0x2ed   :  { %786 = vmatpush.msra.mxu3 %v2156_v54 }
 0x2ef   :  { %787 = vmatpush.msra.mxu3 %v2163_v55 }
 0x2f1   :  { %788 = vmatpush.msra.mxu3 %v2168_v56 }
 0x2f3   :  { %789 = vmatpush.msra.mxu3 %v2185_v59 }
 0x367   :  { %v309_v14 = vpop.f32.mrf.mxu3 }
 0x368   :  { %v310_v15 = vadd.f32 %v2256_v13, %v309_v14 }
 0x36a   :  { %v335_v16 = vadd.f32 %v333_v11, %v310_v15 }
 0x36c   :  { %v1691_v17 = vmul.f32 -1.442695, %v335_v16 }
 0x36e   :  { %1758 = vpow2.f32 %v1691_v17 }
 0x36f   :  { %v391_v18 = vpop.f32.mrf.mxu3 }
 0x370   :  { %v392_v19 = vadd.f32 %v2137_v29, %v391_v18 }
 0x372   :  { %v395_v20 = vrot.slane %v392_v19, 6 }
 0x374   :  { %v1759_v21 = vpop.eup %1758  ;;  %417 = vrot.lane.b32.xlu0 %v395_v20, %s1974_s28  ;;  %v397_v38 = vadd.f32 %v395_v20, %v2147_v34 }
 0x375   :  { %v339_v22 = vadd.f32 1.0, %v1759_v21 }
 0x376   :  { %v1693_v39 = vmul.f32 -1.442695, %v397_v38 }
 0x377   :  { %1760 = vrcp.f32 %v339_v22  ;;  %v351_v26 = vand.u32 2147483648, %v339_v22  ;;  %v349_v28 = vand.u32 2147483647, %v339_v22  ;;  %vm345_vm13 = vweird.f32 %v339_v22 }
 0x378   :  { %1762 = vpow2.f32 %v1693_v39 }
 0x379   :  { %v352_v33 = vor.u32 1.1754944e-38, %v351_v26  ;;  %vm350_vm15 = vcmp.eq.f32.partialorder %v349_v28, 8.507059e+37 }
 0x37d   :  { %v1761_v23 = vpop.eup %1760 }
 0x37e   :  { %v341_v24 = vmul.f32 %v1761_v23, %v339_v22  ;;  %vm346_vm12 = vweird.f32 %v1761_v23  ;;  %v1763_v40 = vpop.eup %1762 }
 0x37f   :  { %vm347_vm14 = vmor %vm345_vm13, %vm346_vm12  ;;  %v401_v41 = vadd.f32 1.0, %v1763_v40 }
 0x380   :  { %v342_v25 = vsub.f32 1.0, %v341_v24 }
 0x381   :  { %1764 = vrcp.f32 %v401_v41  ;;  %v413_v47 = vand.u32 2147483648, %v401_v41  ;;  %vm407_vm3 = vweird.f32 %v401_v41  ;;  %v411_v48 = vand.u32 2147483647, %v401_v41 }
 0x382   :  { %v343_v27 = vmul.f32 %v1761_v23, %v342_v25 }
 0x383   :  { %v414_v50 = vor.u32 1.1754944e-38, %v413_v47  ;;  %vm412_vm7 = vcmp.eq.f32.partialorder %v411_v48, 8.507059e+37 }
 0x384   :  { %v344_v30 = vadd.f32 %v1761_v23, %v343_v27 }
 0x386   :  { %v348_v35 = vsel %vm347_vm14, %v1761_v23, %v344_v30 }
 0x387   :  { %v353_v36 = vsel %vm350_vm15, %v352_v33, %v348_v35  ;;  %v1765_v42 = vpop.eup %1764 }
 0x388   :  { %v359_v37 = vmul.f32 %v357_v31, %v353_v36  ;;  %v403_v43 = vmul.f32 %v1765_v42, %v401_v41  ;;  %vm408_vm2 = vweird.f32 %v1765_v42  ;;  %v366_v11 = vsub.f32 1.0, %v353_v36 }
 0x389   :  { %vm409_vm6 = vmor %vm407_vm3, %vm408_vm2  ;;  %v372_v16 = vmul.f32 0.0, %v353_v36 }
 0x38a   :  { %361 = vrot.lane.b32.xlu0 %v359_v37, %s1974_s28  ;;  %v404_v44 = vsub.f32 1.0, %v403_v43 }
 0x38c   :  { %v405_v45 = vmul.f32 %v1765_v42, %v404_v44 }
 0x38e   :  { %v406_v46 = vadd.f32 %v1765_v42, %v405_v45 }
 0x390   :  { %v410_v49 = vsel %vm409_vm6, %v1765_v42, %v406_v46 }
 0x391   :  { %v415_v52 = vsel %vm412_vm7, %v414_v50, %v410_v49 }
 0x392   :  { %v427_v19 = vsub.f32 1.0, %v415_v52 }
 0x3e6   :  { %v418_v51 = vpop.permute.xlu0 %417 }
 0x3e7   :  { %v420_v53 = vmul.f32 %v418_v51, %v415_v52 }
 0x3e9   :  { %422 = vrot.lane.b32.xlu2 %v420_v53, %s1974_s28 }
 0x3fc   :  { %v362_v62 = vpop.permute.xlu0 %361 }
 0x3fd   :  { %v364_v63 = vadd.f32 %v362_v62, %v310_v15  ;;  %v433_v15 = vrot.slane %v2230_v2, 6 }
 0x3ff   :  { %1766 = vtanh.f32 %v364_v63  ;;  %v435_v21 = vmul.f32 %v433_v15, %v415_v52 }
 0x405   :  { %v1767_v0 = vpop.eup %1766 }
 0x406   :  { %368 = vrot.lane.b32.xlu2 %v1767_v0, %s1975_s7 }
 0x443   :  { %v423_v1 = vpop.permute.xlu2 %422 }
 0x444   :  { %v425_v3 = vadd.f32 %v423_v1, %v2147_v34 }
 0x446   :  { %1768 = vtanh.f32 %v425_v3 }
 0x44c   :  { %v1769_v9 = vpop.eup %1768 }
 0x44d   :  { %429 = vrot.lane.b32.xlu1 %v1769_v9, %s1975_s7 }
 0x460   :  { %v369_v14 = vpop.permute.xlu2 %368 }
 0x461   :  { %v371_v17 = vmul.f32 %v369_v14, %v366_v11 }
 0x463   :  { %v2267_v18 = vadd.f32 %v372_v16, %v371_v17 }
 0x465   :  { %464 = vrot.lane.b32.xlu1 %v2267_v18, %s1975_s7 }
 0x4bf   :  { %v430_v20 = vpop.permute.xlu1 %429 }
 0x4c0   :  { %v432_v22 = vmul.f32 %v430_v20, %v427_v19 }
 0x4c2   :  { %v2272_v23 = vadd.f32 %v435_v21, %v432_v22 }
 0x4c4   :  { %v438_v24 = vrot.slane %v2272_v23, 2  ;;  %v586_v15 = vrot.slane %v2272_v23, 6 }
 0x4c6   :  { %439 = vrot.lane.b32.xlu0 %v438_v24, %s1975_s7 }
 0x4d7   :  { %v465_v25 = vpop.permute.xlu1 %464 }
 0x4d8   :  { %1695 = vmatmul.msk.f32.vlgmr.msrb.gmra.mxu1 %vm221_vm11, %v465_v25 }
 0x4d9   :  { %910 = vmatpush.msrb.mxu1 %v2174_v57 }
 0x4db   :  { %911 = vmatpush.msrb.mxu1 %v2179_v58 }
 0x4dd   :  { %912 = vmatpush.msrb.mxu1 %v2193_v60 }
 0x4df   :  { %913 = vmatpush.msrb.mxu1 %v2202_v61 }
 0x538   :  { %v440_v2 = vpop.permute.xlu0 %439 }
 0x539   :  { %1694 = vmatmul.msk.f32.vlgmr.msrb.gmra.mxu0 %vm221_vm11, %v440_v2  ;;  %1697 = vmatmul.msk.f32.vlgmr.msrb.gmra.mxu2 %vm221_vm11, %v440_v2 }
 0x53a   :  { %845 = vmatpush.msrb.mxu0 %v2098_v5  ;;  %935 = vmatpush.msrb.mxu2 %v2156_v54 }
 0x53c   :  { %846 = vmatpush.msrb.mxu0 %v2103_v6  ;;  %936 = vmatpush.msrb.mxu2 %v2163_v55 }
 0x53e   :  { %847 = vmatpush.msrb.mxu0 %v2109_v7  ;;  %937 = vmatpush.msrb.mxu2 %v2168_v56 }
 0x540   :  { %848 = vmatpush.msrb.mxu0 %v2115_v8  ;;  %938 = vmatpush.msrb.mxu2 %v2185_v59 }
 0x555   :  { %v485_v26 = vpop.f32.mrf.mxu1 }
 0x556   :  { %v486_v27 = vadd.f32 %v2244_v4, %v485_v26 }
 0x558   :  { %509 = vrot.lane.b32.xlu0 %v486_v27, %s1974_s28 }
 0x5b6   :  { %v460_v28 = vpop.f32.mrf.mxu0 }
 0x5b7   :  { %v461_v30 = vadd.f32 %v2256_v13, %v460_v28 }
 0x5b9   :  { %v488_v31 = vadd.f32 %v486_v27, %v461_v30 }
 0x5bb   :  { %v1696_v33 = vmul.f32 -1.442695, %v488_v31 }
 0x5bc   :  { %v544_v35 = vpop.f32.mrf.mxu2 }
 0x5bd   :  { %1770 = vpow2.f32 %v1696_v33  ;;  %v545_v36 = vadd.f32 %v2137_v29, %v544_v35 }
 0x5bf   :  { %v548_v37 = vrot.slane %v545_v36, 4 }
 0x5c1   :  { %v550_v38 = vadd.f32 %v548_v37, %v2147_v34  ;;  %570 = vrot.lane.b32.xlu2 %v548_v37, %s1974_s28 }
 0x5c3   :  { %v1771_v39 = vpop.eup %1770  ;;  %v1698_v40 = vmul.f32 -1.442695, %v550_v38 }
 0x5c4   :  { %v492_v41 = vadd.f32 1.0, %v1771_v39 }
 0x5c5   :  { %1772 = vpow2.f32 %v1698_v40 }
 0x5c6   :  { %1774 = vrcp.f32 %v492_v41  ;;  %v504_v47 = vand.u32 2147483648, %v492_v41  ;;  %v502_v49 = vand.u32 2147483647, %v492_v41  ;;  %vm498_vm9 = vweird.f32 %v492_v41 }
 0x5c8   :  { %v505_v52 = vor.u32 1.1754944e-38, %v504_v47  ;;  %vm503_vm12 = vcmp.eq.f32.partialorder %v502_v49, 8.507059e+37 }
 0x5ca   :  { %v510_v0 = vpop.permute.xlu0 %509 }
 0x5cb   :  { %v1773_v42 = vpop.eup %1772 }
 0x5cc   :  { %v1775_v43 = vpop.eup %1774  ;;  %v554_v44 = vadd.f32 1.0, %v1773_v42 }
 0x5cd   :  { %v494_v45 = vmul.f32 %v1775_v43, %v492_v41  ;;  %vm499_vm8 = vweird.f32 %v1775_v43 }
 0x5ce   :  { %1776 = vrcp.f32 %v554_v44  ;;  %vm500_vm10 = vmor %vm498_vm9, %vm499_vm8  ;;  %v566_v9 = vand.u32 2147483648, %v554_v44  ;;  %v564_v14 = vand.u32 2147483647, %v554_v44  ;;  %vm560_vm14 = vweird.f32 %v554_v44 }
 0x5cf   :  { %v495_v46 = vsub.f32 1.0, %v494_v45 }
 0x5d0   :  { %v567_v17 = vor.u32 1.1754944e-38, %v566_v9  ;;  %vm565_vm2 = vcmp.eq.f32.partialorder %v564_v14, 8.507059e+37 }
 0x5d1   :  { %v496_v48 = vmul.f32 %v1775_v43, %v495_v46 }
 0x5d3   :  { %v497_v50 = vadd.f32 %v1775_v43, %v496_v48 }
 0x5d4   :  { %v1777_v51 = vpop.eup %1776 }
 0x5d5   :  { %v501_v53 = vsel %vm500_vm10, %v1775_v43, %v497_v50  ;;  %v556_v62 = vmul.f32 %v1777_v51, %v554_v44  ;;  %vm561_vm13 = vweird.f32 %v1777_v51 }
 0x5d6   :  { %v506_v63 = vsel %vm503_vm12, %v505_v52, %v501_v53  ;;  %vm562_vm15 = vmor %vm560_vm14, %vm561_vm13 }
 0x5d7   :  { %v512_v1 = vmul.f32 %v510_v0, %v506_v63  ;;  %v557_v3 = vsub.f32 1.0, %v556_v62  ;;  %v519_v23 = vsub.f32 1.0, %v506_v63  ;;  %v525_v35 = vmul.f32 %v506_v63, %v2267_v18 }
 0x5d9   :  { %514 = vrot.lane.b32.xlu2 %v512_v1, %s1974_s28  ;;  %v558_v11 = vmul.f32 %v1777_v51, %v557_v3 }
 0x5db   :  { %v559_v16 = vadd.f32 %v1777_v51, %v558_v11 }
 0x5dd   :  { %v563_v19 = vsel %vm562_vm15, %v1777_v51, %v559_v16 }
 0x5de   :  { %v568_v20 = vsel %vm565_vm2, %v567_v17, %v563_v19 }
 0x5df   :  { %v588_v21 = vmul.f32 %v586_v15, %v568_v20 }
 0x61b   :  { %v571_v22 = vpop.permute.xlu2 %570 }
 0x61c   :  { %v573_v24 = vmul.f32 %v571_v22, %v568_v20 }
 0x61e   :  { %575 = vrot.lane.b32.xlu1 %v573_v24, %s1974_s28 }
 0x633   :  { %v515_v25 = vpop.permute.xlu2 %514 }
 0x634   :  { %v517_v2 = vadd.f32 %v515_v25, %v461_v30  ;;  %v580_v30 = vsub.f32 1.0, %v568_v20 }
 0x636   :  { %1778 = vtanh.f32 %v517_v2 }
 0x63c   :  { %v1779_v26 = vpop.eup %1778 }
 0x63d   :  { %521 = vrot.lane.b32.xlu1 %v1779_v26, %s1975_s7 }
 0x690   :  { %v576_v27 = vpop.permute.xlu1 %575 }
 0x691   :  { %v578_v28 = vadd.f32 %v576_v27, %v2147_v34 }
 0x693   :  { %1780 = vtanh.f32 %v578_v28 }
 0x699   :  { %v1781_v31 = vpop.eup %1780 }
 0x69a   :  { %582 = vrot.lane.b32.xlu0 %v1781_v31, %s1975_s7 }
 0x6af   :  { %v522_v33 = vpop.permute.xlu1 %521 }
 0x6b0   :  { %v524_v36 = vmul.f32 %v522_v33, %v519_v23 }
 0x6b2   :  { %v2304_v37 = vadd.f32 %v525_v35, %v524_v36 }
 0x6b4   :  { %617 = vrot.lane.b32.xlu0 %v2304_v37, %s1975_s7 }
 0x70c   :  { %v583_v38 = vpop.permute.xlu0 %582 }
 0x70d   :  { %v585_v39 = vmul.f32 %v583_v38, %v580_v30 }
 0x70f   :  { %v2308_v40 = vadd.f32 %v588_v21, %v585_v39 }
 0x711   :  { %v591_v41 = vrot.slane %v2308_v40, 4 }
 0x713   :  { %592 = vrot.lane.b32.xlu2 %v591_v41, %s1975_s7 }
 0x726   :  { %v618_v42 = vpop.permute.xlu0 %617 }
 0x727   :  { %1700 = vmatmul.msk.f32.vlgmr.msra.gmra.mxu0 %vm221_vm11, %v618_v42 }
 0x728   :  { %1063 = vmatpush.msra.mxu0 %v2174_v57 }
 0x72a   :  { %1064 = vmatpush.msra.mxu0 %v2179_v58 }
 0x72c   :  { %1065 = vmatpush.msra.mxu0 %v2193_v60 }
 0x72e   :  { %1066 = vmatpush.msra.mxu0 %v2202_v61 }
 0x76d   :  { %v593_v43 = vpop.permute.xlu2 %592 }
 0x76e   :  { %1699 = vmatmul.msk.f32.vlgmr.msrb.gmra.mxu3 %vm221_vm11, %v593_v43  ;;  %1702 = vmatmul.msk.f32.vlgmr.msra.gmra.mxu1 %vm221_vm11, %v593_v43 }
 0x76f   :  { %994 = vmatpush.msrb.mxu3 %v2098_v5  ;;  %1088 = vmatpush.msra.mxu1 %v2156_v54 }
 0x771   :  { %995 = vmatpush.msrb.mxu3 %v2103_v6  ;;  %1089 = vmatpush.msra.mxu1 %v2163_v55 }
 0x773   :  { %996 = vmatpush.msrb.mxu3 %v2109_v7  ;;  %1090 = vmatpush.msra.mxu1 %v2168_v56 }
 0x775   :  { %997 = vmatpush.msrb.mxu3 %v2115_v8  ;;  %1091 = vmatpush.msra.mxu1 %v2185_v59 }
 0x7a4   :  { %v638_v44 = vpop.f32.mrf.mxu0 }
 0x7a5   :  { %v639_v45 = vadd.f32 %v2244_v4, %v638_v44 }
 0x7a7   :  { %662 = vrot.lane.b32.xlu2 %v639_v45, %s1974_s28 }
 0x7eb   :  { %v697_v46 = vpop.f32.mrf.mxu1 }
 0x7ec   :  { %v698_v47 = vadd.f32 %v2137_v29, %v697_v46 }
 0x7ee   :  { %v701_v48 = vrot.slane %v698_v47, 2 }
 0x7f0   :  { %723 = vrot.lane.b32.xlu1 %v701_v48, %s1974_s28  ;;  %v703_v21 = vadd.f32 %v701_v48, %v2147_v34 }
 0x7f1   :  { %v613_v49 = vpop.f32.mrf.mxu3 }
 0x7f2   :  { %v614_v50 = vadd.f32 %v2256_v13, %v613_v49  ;;  %v1703_v22 = vmul.f32 -1.442695, %v703_v21 }
 0x7f4   :  { %v641_v51 = vadd.f32 %v639_v45, %v614_v50 }
 0x7f6   :  { %v1701_v52 = vmul.f32 -1.442695, %v641_v51 }
 0x7f8   :  { %1782 = vpow2.f32 %v1701_v52 }
 0x7fe   :  { %v1783_v53 = vpop.eup %1782 }
 0x7ff   :  { %v645_v62 = vadd.f32 1.0, %v1783_v53 }
 0x801   :  { %1784 = vrcp.f32 %v645_v62  ;;  %v657_v3 = vand.u32 2147483648, %v645_v62  ;;  %v655_v11 = vand.u32 2147483647, %v645_v62  ;;  %vm651_vm6 = vweird.f32 %v645_v62  ;;  %v663_v15 = vpop.permute.xlu2 %662 }
 0x802   :  { %1786 = vpow2.f32 %v1703_v22 }
 0x803   :  { %v658_v16 = vor.u32 1.1754944e-38, %v657_v3  ;;  %vm656_vm8 = vcmp.eq.f32.partialorder %v655_v11, 8.507059e+37 }
 0x807   :  { %v1785_v63 = vpop.eup %1784 }
 0x808   :  { %v647_v0 = vmul.f32 %v1785_v63, %v645_v62  ;;  %vm652_vm3 = vweird.f32 %v1785_v63  ;;  %v1787_v24 = vpop.eup %1786 }
 0x809   :  { %vm653_vm7 = vmor %vm651_vm6, %vm652_vm3  ;;  %v707_v25 = vadd.f32 1.0, %v1787_v24 }
 0x80a   :  { %v648_v1 = vsub.f32 1.0, %v647_v0 }
 0x80b   :  { %1788 = vrcp.f32 %v707_v25  ;;  %v719_v23 = vand.u32 2147483648, %v707_v25  ;;  %vm713_vm10 = vweird.f32 %v707_v25  ;;  %v717_v33 = vand.u32 2147483647, %v707_v25 }
 0x80c   :  { %v649_v9 = vmul.f32 %v1785_v63, %v648_v1 }
 0x80d   :  { %v720_v36 = vor.u32 1.1754944e-38, %v719_v23  ;;  %vm718_vm13 = vcmp.eq.f32.partialorder %v717_v33, 8.507059e+37  ;;  %v2373_v33 = vadd.f32 %v2144_v32, %v2251_v12 }
 0x80e   :  { %v650_v14 = vadd.f32 %v1785_v63, %v649_v9 }
 0x810   :  { %v654_v17 = vsel %vm653_vm7, %v1785_v63, %v650_v14 }
 0x811   :  { %v659_v19 = vsel %vm656_vm8, %v658_v16, %v654_v17  ;;  %v1789_v2 = vpop.eup %1788 }
 0x812   :  { %v665_v20 = vmul.f32 %v663_v15, %v659_v19  ;;  %v709_v26 = vmul.f32 %v1789_v2, %v707_v25  ;;  %vm714_vm9 = vweird.f32 %v1789_v2  ;;  %v672_v47 = vsub.f32 1.0, %v659_v19 }
 0x813   :  { %vm715_vm12 = vmor %vm713_vm10, %vm714_vm9  ;;  %v678_v49 = vmul.f32 %v659_v19, %v2304_v37 }
 0x814   :  { %667 = vrot.lane.b32.xlu1 %v665_v20, %s1974_s28  ;;  %v710_v27 = vsub.f32 1.0, %v709_v26 }
 0x816   :  { %v711_v28 = vmul.f32 %v1789_v2, %v710_v27 }
 0x818   :  { %v712_v31 = vadd.f32 %v1789_v2, %v711_v28 }
 0x81a   :  { %v716_v35 = vsel %vm715_vm12, %v1789_v2, %v712_v31 }
 0x81b   :  { %v721_v38 = vsel %vm718_vm13, %v720_v36, %v716_v35 }
 0x81c   :  { %v733_v53 = vsub.f32 1.0, %v721_v38 }
 0x862   :  { %v724_v30 = vpop.permute.xlu1 %723 }
 0x863   :  { %v726_v39 = vmul.f32 %v724_v30, %v721_v38 }
 0x865   :  { %728 = vrot.lane.b32.xlu0 %v726_v39, %s1974_s28 }
 0x886   :  { %v668_v41 = vpop.permute.xlu1 %667 }
 0x887   :  { %v670_v42 = vadd.f32 %v668_v41, %v614_v50  ;;  %v739_v50 = vrot.slane %v2308_v40, 6 }
 0x889   :  { %1790 = vtanh.f32 %v670_v42  ;;  %v741_v63 = vmul.f32 %v739_v50, %v721_v38 }
 0x88f   :  { %v1791_v43 = vpop.eup %1790 }
 0x890   :  { %674 = vrot.lane.b32.xlu0 %v1791_v43, %s1975_s7 }
 0x8d7   :  { %v729_v44 = vpop.permute.xlu0 %728 }
 0x8d8   :  { %v731_v45 = vadd.f32 %v729_v44, %v2147_v34 }
 0x8da   :  { %1792 = vtanh.f32 %v731_v45 }
 0x8e0   :  { %v1793_v46 = vpop.eup %1792 }
 0x8e1   :  { %735 = vrot.lane.b32.xlu2 %v1793_v46, %s1975_s7 }
 0x902   :  { %v675_v48 = vpop.permute.xlu0 %674 }
 0x903   :  { %v677_v51 = vmul.f32 %v675_v48, %v672_v47 }
 0x905   :  { %v2339_v52 = vadd.f32 %v678_v49, %v677_v51 }
 0x907   :  { %770 = vrot.lane.b32.xlu2 %v2339_v52, %s1975_s7 }
 0x93b   :  { %v736_v62 = vpop.permute.xlu2 %735 }
 0x93c   :  { %v738_v34 = vmul.f32 %v736_v62, %v733_v53 }
 0x93e   :  { %v2344_v0 = vadd.f32 %v741_v63, %v738_v34 }
 0x940   :  { %v744_v1 = vrot.slane %v2344_v0, 6  ;;  %v1858_v0 = vld [vmem:[%s2592_s6 + $0x18] sm:$0xff] }
 0x942   :  { %745 = vrot.lane.b32.xlu1 %v744_v1, %s1975_s7 }
 0x961   :  { %v771_v3 = vpop.permute.xlu2 %770 }
 0x962   :  { %1705 = vmatmul.msk.f32.vlgmr.msra.gmra.mxu3 %vm221_vm11, %v771_v3 }
 0x963   :  { %1216 = vmatpush.msra.mxu3 %v2174_v57 }
 0x965   :  { %1217 = vmatpush.msra.mxu3 %v2179_v58 }
 0x967   :  { %1218 = vmatpush.msra.mxu3 %v2193_v60 }
 0x969   :  { %1219 = vmatpush.msra.mxu3 %v2202_v61 }
 0x9b4   :  { %v746_v40 = vpop.permute.xlu1 %745 }
 0x9b5   :  { %1704 = vmatmul.msk.f32.vlgmr.msra.gmra.mxu2 %vm221_vm11, %v746_v40  ;;  %1707 = vmatmul.msk.f32.vlgmr.msrb.gmra.mxu0 %vm221_vm11, %v746_v40 }
 0x9b6   :  { %1147 = vmatpush.msra.mxu2 %v2098_v5  ;;  %1241 = vmatpush.msrb.mxu0 %v2156_v54 }
 0x9b8   :  { %1148 = vmatpush.msra.mxu2 %v2103_v6  ;;  %1242 = vmatpush.msrb.mxu0 %v2163_v55 }
 0x9ba   :  { %1149 = vmatpush.msra.mxu2 %v2109_v7  ;;  %1243 = vmatpush.msrb.mxu0 %v2168_v56 }
 0x9bc   :  { %1150 = vmatpush.msra.mxu2 %v2115_v8  ;;  %1244 = vmatpush.msrb.mxu0 %v2185_v59 }
 0x9e5   :  { %v791_v9 = vpop.f32.mrf.mxu3 }
 0x9e6   :  { %v792_v11 = vadd.f32 %v2244_v4, %v791_v9 }
 0x9e8   :  { %815 = vrot.lane.b32.xlu1 %v792_v11, %s1974_s28 }
 0xa32   :  { %v850_v5 = vpop.f32.mrf.mxu0 }
 0xa33   :  { %v851_v14 = vadd.f32 %v2137_v29, %v850_v5 }
 0xa35   :  { %874 = vrot.lane.b32.xlu0 %v851_v14, %s1974_s28  ;;  %v853_v35 = vadd.f32 %v851_v14, %v2373_v33 }
 0xa37   :  { %v1708_v36 = vmul.f32 -1.442695, %v853_v35 }
 0xa38   :  { %v766_v6 = vpop.f32.mrf.mxu2 }
 0xa39   :  { %v767_v16 = vadd.f32 %v2256_v13, %v766_v6 }
 0xa3b   :  { %v794_v7 = vadd.f32 %v792_v11, %v767_v16 }
 0xa3d   :  { %v1706_v17 = vmul.f32 -1.442695, %v794_v7 }
 0xa3f   :  { %1794 = vpow2.f32 %v1706_v17 }
 0xa45   :  { %v1795_v15 = vpop.eup %1794 }
 0xa46   :  { %v798_v8 = vadd.f32 1.0, %v1795_v15 }
 0xa48   :  { %1796 = vrcp.f32 %v798_v8  ;;  %v810_v24 = vand.u32 2147483648, %v798_v8  ;;  %vm804_vm15 = vweird.f32 %v798_v8  ;;  %v808_v2 = vand.u32 2147483647, %v798_v8 }
 0xa49   :  { %1798 = vpow2.f32 %v1708_v36 }
 0xa4a   :  { %v811_v27 = vor.u32 1.1754944e-38, %v810_v24  ;;  %vm809_vm3 = vcmp.eq.f32.partialorder %v808_v2, 8.507059e+37 }
 0xa4e   :  { %v1797_v19 = vpop.eup %1796 }
 0xa4f   :  { %v800_v20 = vmul.f32 %v1797_v19, %v798_v8  ;;  %vm805_vm14 = vweird.f32 %v1797_v19  ;;  %v1799_v30 = vpop.eup %1798 }
 0xa50   :  { %vm806_vm2 = vmor %vm804_vm15, %vm805_vm14  ;;  %v857_v38 = vadd.f32 1.0, %v1799_v30 }
 0xa51   :  { %v801_v21 = vsub.f32 1.0, %v800_v20 }
 0xa52   :  { %1800 = vrcp.f32 %v857_v38  ;;  %v869_v45 = vand.u32 2147483648, %v857_v38  ;;  %vm863_vm7 = vweird.f32 %v857_v38  ;;  %v867_v46 = vand.u32 2147483647, %v857_v38 }
 0xa53   :  { %v802_v22 = vmul.f32 %v1797_v19, %v801_v21 }
 0xa54   :  { %v870_v32 = vor.u32 1.1754944e-38, %v869_v45  ;;  %vm868_vm9 = vcmp.eq.f32.partialorder %v867_v46, 8.507059e+37 }
 0xa55   :  { %v803_v25 = vadd.f32 %v1797_v19, %v802_v22 }
 0xa57   :  { %v807_v26 = vsel %vm806_vm2, %v1797_v19, %v803_v25 }
 0xa58   :  { %v812_v31 = vsel %vm809_vm3, %v811_v27, %v807_v26  ;;  %v1801_v39 = vpop.eup %1800 }
 0xa59   :  { %v859_v41 = vmul.f32 %v1801_v39, %v857_v38  ;;  %vm864_vm6 = vweird.f32 %v1801_v39  ;;  %v825_v3 = vsub.f32 1.0, %v812_v31  ;;  %v831_v9 = vmul.f32 %v812_v31, %v2339_v52 }
 0xa5a   :  { %v816_v28 = vpop.permute.xlu1 %815  ;;  %vm865_vm8 = vmor %vm863_vm7, %vm864_vm6 }
 0xa5b   :  { %v818_v23 = vmul.f32 %v816_v28, %v812_v31  ;;  %v860_v42 = vsub.f32 1.0, %v859_v41 }
 0xa5d   :  { %820 = vrot.lane.b32.xlu0 %v818_v23, %s1974_s28  ;;  %v861_v43 = vmul.f32 %v1801_v39, %v860_v42 }
 0xa5f   :  { %v862_v44 = vadd.f32 %v1801_v39, %v861_v43 }
 0xa61   :  { %v866_v47 = vsel %vm865_vm8, %v1801_v39, %v862_v44 }
 0xa62   :  { %v871_v48 = vsel %vm868_vm9, %v870_v32, %v866_v47 }
 0xa63   :  { %v884_v14 = vsub.f32 1.0, %v871_v48 }
 0xaa7   :  { %v875_v12 = vpop.permute.xlu0 %874 }
 0xaa8   :  { %v877_v49 = vmul.f32 %v875_v12, %v871_v48 }
 0xaaa   :  { %879 = vrot.lane.b32.xlu2 %v877_v49, %s1974_s28 }
 0xacf   :  { %v821_v51 = vpop.permute.xlu0 %820 }
 0xad0   :  { %v823_v50 = vadd.f32 %v821_v51, %v767_v16  ;;  %v891_v16 = vmul.f32 %v871_v48, %v744_v1 }
 0xad2   :  { %1802 = vtanh.f32 %v823_v50 }
 0xad8   :  { %v1803_v53 = vpop.eup %1802 }
 0xad9   :  { %827 = vrot.lane.b32.xlu2 %v1803_v53, %s1975_s7 }
 0xb04   :  { %v880_v62 = vpop.permute.xlu2 %879 }
 0xb05   :  { %v882_v63 = vadd.f32 %v880_v62, %v2373_v33 }
 0xb07   :  { %1804 = vtanh.f32 %v882_v63 }
 0xb0d   :  { %v1805_v34 = vpop.eup %1804 }
 0xb0e   :  { %886 = vrot.lane.b32.xlu1 %v1805_v34, %s1975_s7 }
 0xb33   :  { %v828_v40 = vpop.permute.xlu2 %827 }
 0xb34   :  { %v830_v11 = vmul.f32 %v828_v40, %v825_v3 }
 0xb36   :  { %v2381_v5 = vadd.f32 %v831_v9, %v830_v11 }
 0xb38   :  { %919 = vrot.lane.b32.xlu1 %v2381_v5, %s1975_s7 }
 0xb80   :  { %v887_v6 = vpop.permute.xlu1 %886 }
 0xb81   :  { %v889_v7 = vmul.f32 %v887_v6, %v884_v14 }
 0xb83   :  { %v2387_v17 = vadd.f32 %v891_v16, %v889_v7 }
 0xb85   :  { %894 = vrot.lane.b32.xlu0 %v2387_v17, %s1975_s7  ;;  %v1041_v43 = vrot.slane %v2387_v17, 6 }
 0xbaa   :  { %v920_v15 = vpop.permute.xlu1 %919 }
 0xbab   :  { %1710 = vmatmul.msk.f32.vlgmr.msrb.gmra.mxu2 %vm221_vm11, %v920_v15 }
 0xbac   :  { %1369 = vmatpush.msrb.mxu2 %v2174_v57  ;;  %v1859_v57 = vld [vmem:[%s2592_s6 + $0x10] sm:$0xff] }
 0xbae   :  { %1370 = vmatpush.msrb.mxu2 %v2179_v58  ;;  %v1860_v58 = vld [vmem:[%s2592_s6 + $0x8] sm:$0xff] }
 0xbb0   :  { %1371 = vmatpush.msrb.mxu2 %v2193_v60  ;;  %v1861_v60 = vld [vmem:[%s2592_s6] sm:$0xff] }
 0xbb2   :  { %1372 = vmatpush.msrb.mxu2 %v2202_v61 }
 0xbf7   :  { %v895_v8 = vpop.permute.xlu0 %894 }
 0xbf8   :  { %1709 = vmatmul.msk.f32.vlgmr.msrb.gmra.mxu1 %vm221_vm11, %v895_v8  ;;  %1712 = vmatmul.msk.f32.vlgmr.msrb.gmra.mxu3 %vm221_vm11, %v895_v8 }
 0xbf9   :  { %1300 = vmatpush.msrb.mxu1 %v1858_v0  ;;  %1394 = vmatpush.msrb.mxu3 %v2156_v54 }
 0xbfb   :  { %1301 = vmatpush.msrb.mxu1 %v1859_v57  ;;  %1395 = vmatpush.msrb.mxu3 %v2163_v55 }
 0xbfd   :  { %1302 = vmatpush.msrb.mxu1 %v1860_v58  ;;  %1396 = vmatpush.msrb.mxu3 %v2168_v56 }
 0xbff   :  { %1303 = vmatpush.msrb.mxu1 %v1861_v60  ;;  %1397 = vmatpush.msrb.mxu3 %v2185_v59 }
 0xc2e   :  { %v940_v54 = vpop.f32.mrf.mxu2 }
 0xc2f   :  { %v941_v61 = vadd.f32 %v2244_v4, %v940_v54 }
 0xc31   :  { %964 = vrot.lane.b32.xlu0 %v941_v61, %s1974_s28 }
 0xc75   :  { %v915_v55 = vpop.f32.mrf.mxu1 }
 0xc76   :  { %v916_v1 = vadd.f32 %v2256_v13, %v915_v55 }
 0xc78   :  { %v943_v19 = vadd.f32 %v941_v61, %v916_v1 }
 0xc7a   :  { %v1711_v20 = vmul.f32 -1.442695, %v943_v19 }
 0xc7b   :  { %v999_v21 = vpop.f32.mrf.mxu3 }
 0xc7c   :  { %1806 = vpow2.f32 %v1711_v20  ;;  %v1000_v56 = vadd.f32 %v2137_v29, %v999_v21 }
 0xc7e   :  { %v1003_v22 = vrot.slane %v1000_v56, 6 }
 0xc80   :  { %v1005_v24 = vadd.f32 %v1003_v22, %v2373_v33  ;;  %1025 = vrot.lane.b32.xlu2 %v1003_v22, %s1974_s28  ;;  %v2441_v22 = vld [vmem:[%s2594_s8] ss:$0 sm:$0xff]  ;;  %s2613_s8 = sld [smem:[#allocation14_spill]] }
 0xc82   :  { %v1807_v59 = vpop.eup %1806  ;;  %v1713_v25 = vmul.f32 -1.442695, %v1005_v24 }
 0xc83   :  { %v947_v2 = vadd.f32 1.0, %v1807_v59 }
 0xc84   :  { %1808 = vpow2.f32 %v1713_v25 }
 0xc85   :  { %1810 = vrcp.f32 %v947_v2  ;;  %v959_v47 = vand.u32 2147483648, %v947_v2  ;;  %vm953_vm2 = vweird.f32 %v947_v2  ;;  %v957_v12 = vand.u32 2147483647, %v947_v2 }
 0xc87   :  { %v960_v51 = vor.u32 1.1754944e-38, %v959_v47  ;;  %vm958_vm6 = vcmp.eq.f32.partialorder %v957_v12, 8.507059e+37 }
 0xc8a   :  { %v1809_v26 = vpop.eup %1808 }
 0xc8b   :  { %v1009_v27 = vadd.f32 1.0, %v1809_v26  ;;  %v1811_v28 = vpop.eup %1810 }
 0xc8c   :  { %v949_v31 = vmul.f32 %v1811_v28, %v947_v2  ;;  %vm954_vm14 = vweird.f32 %v1811_v28 }
 0xc8d   :  { %1812 = vrcp.f32 %v1009_v27  ;;  %v1021_v29 = vand.u32 2147483648, %v1009_v27  ;;  %v1019_v41 = vand.u32 2147483647, %v1009_v27  ;;  %vm1015_vm12 = vweird.f32 %v1009_v27  ;;  %vm955_vm3 = vmor %vm953_vm2, %vm954_vm14 }
 0xc8e   :  { %v950_v35 = vsub.f32 1.0, %v949_v31 }
 0xc8f   :  { %v1022_v44 = vor.u32 1.1754944e-38, %v1021_v29  ;;  %vm1020_vm15 = vcmp.eq.f32.partialorder %v1019_v41, 8.507059e+37 }
 0xc90   :  { %v951_v38 = vmul.f32 %v1811_v28, %v950_v35 }
 0xc92   :  { %v952_v45 = vadd.f32 %v1811_v28, %v951_v38 }
 0xc93   :  { %v1813_v23 = vpop.eup %1812 }
 0xc94   :  { %v1011_v36 = vmul.f32 %v1813_v23, %v1009_v27  ;;  %vm1016_vm10 = vweird.f32 %v1813_v23  ;;  %v956_v49 = vsel %vm955_vm3, %v1811_v28, %v952_v45 }
 0xc95   :  { %vm1017_vm13 = vmor %vm1015_vm12, %vm1016_vm10  ;;  %v961_v53 = vsel %vm958_vm6, %v960_v51, %v956_v49 }
 0xc96   :  { %v1012_v30 = vsub.f32 1.0, %v1011_v36  ;;  %v974_v16 = vsub.f32 1.0, %v961_v53  ;;  %v980_v17 = vmul.f32 %v961_v53, %v2381_v5 }
 0xc98   :  { %v1013_v39 = vmul.f32 %v1813_v23, %v1012_v30 }
 0xc9a   :  { %v1014_v42 = vadd.f32 %v1813_v23, %v1013_v39 }
 0xc9c   :  { %v1018_v46 = vsel %vm1017_vm13, %v1813_v23, %v1014_v42 }
 0xc9d   :  { %v1023_v32 = vsel %vm1020_vm15, %v1022_v44, %v1018_v46 }
 0xc9e   :  { %v1043_v48 = vmul.f32 %v1041_v43, %v1023_v32  ;;  %v1035_v0 = vsub.f32 1.0, %v1023_v32 }
 0xca3   :  { %v965_v50 = vpop.permute.xlu0 %964 }
 0xca4   :  { %v967_v62 = vmul.f32 %v965_v50, %v961_v53 }
 0xca6   :  { %969 = vrot.lane.b32.xlu2 %v967_v62, %s1974_s28 }
 0xcda   :  { %v1026_v63 = vpop.permute.xlu2 %1025 }
 0xcdb   :  { %v1028_v34 = vmul.f32 %v1026_v63, %v1023_v32 }
 0xcdd   :  { %1030 = vrot.lane.b32.xlu1 %v1028_v34, %s1974_s28 }
 0xd00   :  { %v970_v3 = vpop.permute.xlu2 %969 }
 0xd01   :  { %v972_v40 = vadd.f32 %v970_v3, %v916_v1 }
 0xd03   :  { %1814 = vtanh.f32 %v972_v40 }
 0xd09   :  { %v1815_v9 = vpop.eup %1814 }
 0xd0a   :  { %976 = vrot.lane.b32.xlu1 %v1815_v9, %s1975_s7 }
 0xd4f   :  { %v1031_v11 = vpop.permute.xlu1 %1030 }
 0xd50   :  { %v1033_v14 = vadd.f32 %v1031_v11, %v2373_v33 }
 0xd52   :  { %1816 = vtanh.f32 %v1033_v14 }
 0xd58   :  { %v1817_v6 = vpop.eup %1816 }
 0xd59   :  { %1037 = vrot.lane.b32.xlu0 %v1817_v6, %s1975_s7 }
 0xd7c   :  { %v977_v7 = vpop.permute.xlu1 %976 }
 0xd7d   :  { %v979_v15 = vmul.f32 %v977_v7, %v974_v16 }
 0xd7f   :  { %v2427_v8 = vadd.f32 %v980_v17, %v979_v15 }
 0xd81   :  { %1072 = vrot.lane.b32.xlu0 %v2427_v8, %s1975_s7 }
 0xdcb   :  { %v1038_v57 = vpop.permute.xlu0 %1037 }
 0xdcc   :  { %v1040_v58 = vmul.f32 %v1038_v57, %v1035_v0 }
 0xdce   :  { %v1044_v60 = vadd.f32 %v1043_v48, %v1040_v58 }
 0xdd0   :  { %v1046_v54 = vrot.slane %v1044_v60, 2  ;;  %v1194_v43 = vrot.slane %v1044_v60, 6 }
 0xdd2   :  { %1047 = vrot.lane.b32.xlu2 %v1046_v54, %s1975_s7 }
 0xdf3   :  { %v1073_v61 = vpop.permute.xlu0 %1072 }
 0xdf4   :  { %1715 = vmatmul.msk.f32.vlgmr.msra.gmra.mxu1 %vm221_vm11, %v1073_v61 }
 0xe2c   :  { %v1048_v55 = vpop.permute.xlu2 %1047 }
 0xe2d   :  { %1714 = vmatmul.msk.f32.vlgmr.msra.gmra.mxu0 %vm221_vm11, %v1048_v55  ;;  %1717 = vmatmul.msk.f32.vlgmr.msra.gmra.mxu2 %vm221_vm11, %v1048_v55 }
 0xe71   :  { %v1093_v1 = vpop.f32.mrf.mxu1 }
 0xe72   :  { %v1094_v19 = vadd.f32 %v2244_v4, %v1093_v1 }
 0xe74   :  { %1117 = vrot.lane.b32.xlu1 %v1094_v19, %s1974_s28 }
 0xeaa   :  { %v1068_v20 = vpop.f32.mrf.mxu0 }
 0xeab   :  { %v1069_v56 = vadd.f32 %v2256_v13, %v1068_v20 }
 0xead   :  { %v1096_v25 = vadd.f32 %v1094_v19, %v1069_v56 }
 0xeaf   :  { %v1716_v26 = vmul.f32 -1.442695, %v1096_v25 }
 0xeb0   :  { %v1152_v21 = vpop.f32.mrf.mxu2 }
 0xeb1   :  { %v1153_v24 = vadd.f32 %v2441_v22, %v1152_v21 }
 0xeb3   :  { %v1156_v59 = vrot.slane %v1153_v24, 4 }
 0xeb5   :  { %v1158_v2 = vadd.f32 %v1156_v59, %v2373_v33  ;;  %1178 = vrot.lane.b32.xlu2 %v1156_v59, %s1974_s28 }
 0xeb7   :  { %v1718_v4 = vmul.f32 -1.442695, %v1158_v2 }
 0xeb9   :  { %1818 = vpow2.f32 %v1718_v4 }
 0xeba   :  { %1820 = vpow2.f32 %v1716_v26  ;;  %v2475_v26 = vld [vmem:[%s2597_s11] ss:$0 sm:$0xff]  ;;  %s1667_s11 = sshll.u32 %s1976_s25, 4  ;;  %s1668_s11 = int_to_ptr.vmem [resolvable:$true] %s1667_s11 }
 0xebf   :  { %v1819_v27 = vpop.eup %1818 }
 0xec0   :  { %v1162_v28 = vadd.f32 1.0, %v1819_v27  ;;  %v1821_v13 = vpop.eup %1820 }
 0xec1   :  { %v1100_v31 = vadd.f32 1.0, %v1821_v13 }
 0xec2   :  { %1822 = vrcp.f32 %v1162_v28  ;;  %v1174_v30 = vand.u32 2147483648, %v1162_v28  ;;  %v1172_v38 = vand.u32 2147483647, %v1162_v28  ;;  %vm1168_vm8 = vweird.f32 %v1162_v28 }
 0xec3   :  { %1824 = vrcp.f32 %v1100_v31  ;;  %v1112_v49 = vand.u32 2147483648, %v1100_v31  ;;  %vm1106_vm13 = vweird.f32 %v1100_v31  ;;  %v1110_v51 = vand.u32 2147483647, %v1100_v31 }
 0xec4   :  { %v1175_v42 = vor.u32 1.1754944e-38, %v1174_v30  ;;  %vm1173_vm10 = vcmp.eq.f32.partialorder %v1172_v38, 8.507059e+37 }
 0xec5   :  { %v1113_v53 = vor.u32 1.1754944e-38, %v1112_v49  ;;  %vm1111_vm15 = vcmp.eq.f32.partialorder %v1110_v51, 8.507059e+37 }
 0xec8   :  { %v1823_v23 = vpop.eup %1822 }
 0xec9   :  { %v1164_v35 = vmul.f32 %v1823_v23, %v1162_v28  ;;  %vm1169_vm7 = vweird.f32 %v1823_v23  ;;  %v1825_v41 = vpop.eup %1824 }
 0xeca   :  { %vm1170_vm9 = vmor %vm1168_vm8, %vm1169_vm7  ;;  %v1102_v46 = vmul.f32 %v1825_v41, %v1100_v31  ;;  %vm1107_vm12 = vweird.f32 %v1825_v41 }
 0xecb   :  { %v1165_v36 = vsub.f32 1.0, %v1164_v35  ;;  %vm1108_vm14 = vmor %vm1106_vm13, %vm1107_vm12 }
 0xecc   :  { %v1103_v32 = vsub.f32 1.0, %v1102_v46 }
 0xecd   :  { %v1166_v29 = vmul.f32 %v1823_v23, %v1165_v36 }
 0xece   :  { %v1104_v12 = vmul.f32 %v1825_v41, %v1103_v32 }
 0xecf   :  { %v1167_v39 = vadd.f32 %v1823_v23, %v1166_v29 }
 0xed0   :  { %v1105_v48 = vadd.f32 %v1825_v41, %v1104_v12 }
 0xed1   :  { %v1171_v44 = vsel %vm1170_vm9, %v1823_v23, %v1167_v39 }
 0xed2   :  { %v1176_v45 = vsel %vm1173_vm10, %v1175_v42, %v1171_v44  ;;  %v1109_v50 = vsel %vm1108_vm14, %v1825_v41, %v1105_v48 }
 0xed3   :  { %v1196_v47 = vmul.f32 %v1194_v43, %v1176_v45  ;;  %v1114_v63 = vsel %vm1111_vm15, %v1113_v53, %v1109_v50  ;;  %v1188_v60 = vsub.f32 1.0, %v1176_v45 }
 0xed4   :  { %v1127_v17 = vsub.f32 1.0, %v1114_v63  ;;  %v1133_v0 = vmul.f32 %v1114_v63, %v2427_v8 }
 0xee6   :  { %v1118_v62 = vpop.permute.xlu1 %1117 }
 0xee7   :  { %v1120_v34 = vmul.f32 %v1118_v62, %v1114_v63 }
 0xee9   :  { %1122 = vrot.lane.b32.xlu0 %v1120_v34, %s1974_s28 }
 0xf0f   :  { %v1179_v3 = vpop.permute.xlu2 %1178 }
 0xf10   :  { %v1181_v40 = vmul.f32 %v1179_v3, %v1176_v45 }
 0xf12   :  { %1183 = vrot.lane.b32.xlu1 %v1181_v40, %s1974_s28 }
 0xf5b   :  { %v1123_v9 = vpop.permute.xlu0 %1122 }
 0xf5c   :  { %v1125_v11 = vadd.f32 %v1123_v9, %v1069_v56  ;;  %v2466_v56 = vld [vmem:[%s2598_s12] ss:$0 sm:$0xff] }
 0xf5e   :  { %1826 = vtanh.f32 %v1125_v11 }
 0xf64   :  { %v1827_v14 = vpop.eup %1826 }
 0xf65   :  { %1129 = vrot.lane.b32.xlu2 %v1827_v14, %s1975_s7 }
 0xf84   :  { %v1184_v6 = vpop.permute.xlu1 %1183 }
 0xf85   :  { %v1186_v16 = vadd.f32 %v1184_v6, %v2373_v33 }
 0xf87   :  { %1828 = vtanh.f32 %v1186_v16 }
 0xf8d   :  { %v1829_v7 = vpop.eup %1828 }
 0xf8e   :  { %1190 = vrot.lane.b32.xlu0 %v1829_v7, %s1975_s7 }
 0xfbf   :  { %v1130_v15 = vpop.permute.xlu2 %1129 }
 0xfc0   :  { %v1132_v57 = vmul.f32 %v1130_v15, %v1127_v17 }
 0xfc2   :  { %v2452_v58 = vadd.f32 %v1133_v0, %v1132_v57 }
 0xfc4   :  { %1225 = vrot.lane.b32.xlu1 %v2452_v58, %s1975_s7 }
0x1000   :  { %v1191_v54 = vpop.permute.xlu0 %1190 }
0x1001   :  { %v1193_v61 = vmul.f32 %v1191_v54, %v1188_v60 }
0x1003   :  { %v2456_v55 = vadd.f32 %v1196_v47, %v1193_v61 }
0x1005   :  { %v1199_v1 = vrot.slane %v2456_v55, 4 }
0x1007   :  { %1200 = vrot.lane.b32.xlu2 %v1199_v1, %s1975_s7  ;;  %v1347_v1 = vrot.slane %v2456_v55, 6  ;;  %v1441_v55 = vrot.slane %v2304_v37, 6 }
0x1036   :  { %v1226_v19 = vpop.permute.xlu1 %1225 }
0x1037   :  { %1720 = vmatmul.msk.f32.vlgmr.msrb.gmra.mxu0 %vm221_vm11, %v1226_v19 }
0x1061   :  { %v1201_v20 = vpop.permute.xlu2 %1200 }
0x1062   :  { %1719 = vmatmul.msk.f32.vlgmr.msra.gmra.mxu3 %vm221_vm11, %v1201_v20  ;;  %1722 = vmatmul.msk.f32.vlgmr.msrb.gmra.mxu1 %vm221_vm11, %v1201_v20 }
0x10b4   :  { %v1246_v21 = vpop.f32.mrf.mxu0 }
0x10b5   :  { %v1247_v24 = vadd.f32 %v2466_v56, %v1246_v21 }
0x10b7   :  { %1270 = vrot.lane.b32.xlu0 %v1247_v24, %s1974_s28 }
0x10df   :  { %v1305_v59 = vpop.f32.mrf.mxu1 }
0x10e0   :  { %v1306_v25 = vadd.f32 %v2441_v22, %v1305_v59 }
0x10e2   :  { %v1309_v2 = vrot.slane %v1306_v25, 2 }
0x10e4   :  { %1331 = vrot.lane.b32.xlu1 %v1309_v2, %s1974_s28  ;;  %v1311_v41 = vadd.f32 %v1309_v2, %v2373_v33 }
0x10e5   :  { %v1221_v4 = vpop.f32.mrf.mxu3 }
0x10e6   :  { %v1222_v27 = vadd.f32 %v2475_v26, %v1221_v4  ;;  %v1723_v44 = vmul.f32 -1.442695, %v1311_v41 }
0x10e8   :  { %v1249_v28 = vadd.f32 %v1247_v24, %v1222_v27 }
0x10ea   :  { %v1721_v13 = vmul.f32 -1.442695, %v1249_v28  ;;  %v1443_v28 = vrot.slane %v2339_v52, 4  ;;  %v1463_v52 = vld [vmem:[%s2599_s13 + $0x18] sm:$0xff] }
0x10eb   :  { %1490 = vmatpush.msra.mxu0 %v1463_v52 }
0x10ec   :  { %1830 = vpow2.f32 %v1721_v13  ;;  %v1445_v13 = vrot.slane %v2381_v5, 2  ;;  %v1461_v5 = vld [vmem:[%s2599_s13 + $0x8] sm:$0xff] }
0x10f2   :  { %v1831_v31 = vpop.eup %1830 }
0x10f3   :  { %v1253_v23 = vadd.f32 1.0, %v1831_v31  ;;  %v1454_v31 = vsel %vm128_vm4, %v2267_v18, %v1441_v55  ;;  %v1462_v18 = vld [vmem:[%s2599_s13 + $0x10] sm:$0xff] }
0x10f4   :  { %1491 = vmatpush.msra.mxu0 %v1462_v18 }
0x10f5   :  { %1832 = vrcp.f32 %v1253_v23  ;;  %v1265_v38 = vand.u32 2147483648, %v1253_v23  ;;  %vm1259_vm3 = vweird.f32 %v1253_v23  ;;  %v1263_v39 = vand.u32 2147483647, %v1253_v23 }
0x10f6   :  { %1834 = vpow2.f32 %v1723_v44  ;;  %1492 = vmatpush.msra.mxu0 %v1461_v5 }
0x10f7   :  { %v1266_v43 = vor.u32 1.1754944e-38, %v1265_v38  ;;  %vm1264_vm7 = vcmp.eq.f32.partialorder %v1263_v39, 8.507059e+37 }
0x10fb   :  { %v1833_v35 = vpop.eup %1832 }
0x10fc   :  { %v1255_v36 = vmul.f32 %v1833_v35, %v1253_v23  ;;  %vm1260_vm2 = vweird.f32 %v1833_v35  ;;  %v1835_v32 = vpop.eup %1834  ;;  %v1455_v23 = vsel %vm130_vm0, %v1454_v31, %v1443_v28 }
0x10fd   :  { %vm1261_vm6 = vmor %vm1259_vm3, %vm1260_vm2  ;;  %v1315_v12 = vadd.f32 1.0, %v1835_v32 }
0x10fe   :  { %v1256_v22 = vsub.f32 1.0, %v1255_v36 }
0x10ff   :  { %1836 = vrcp.f32 %v1315_v12  ;;  %v1327_v62 = vand.u32 2147483648, %v1315_v12  ;;  %vm1321_vm9 = vweird.f32 %v1315_v12  ;;  %v1325_v63 = vand.u32 2147483647, %v1315_v12 }
0x1100   :  { %v1257_v30 = vmul.f32 %v1833_v35, %v1256_v22 }
0x1101   :  { %v1328_v3 = vor.u32 1.1754944e-38, %v1327_v62  ;;  %vm1326_vm12 = vcmp.eq.f32.partialorder %v1325_v63, 8.507059e+37  ;;  %v1503_v62 = vld [vmem:[%s2601_s15] sm:$0xff] }
0x1102   :  { %v1258_v29 = vadd.f32 %v1833_v35, %v1257_v30 }
0x1104   :  { %v1262_v42 = vsel %vm1261_vm6, %v1833_v35, %v1258_v29  ;;  %v1456_v35 = vsel %vm132_vm5, %v1455_v23, %v1445_v13 }
0x1105   :  { %v1267_v45 = vsel %vm1264_vm7, %v1266_v43, %v1262_v42  ;;  %v1837_v48 = vpop.eup %1836 }
0x1106   :  { %v1317_v49 = vmul.f32 %v1837_v48, %v1315_v12  ;;  %vm1322_vm8 = vweird.f32 %v1837_v48  ;;  %v1280_v0 = vsub.f32 1.0, %v1267_v45  ;;  %v1286_v60 = vmul.f32 %v1267_v45, %v2452_v58 }
0x1107   :  { %vm1323_vm10 = vmor %vm1321_vm9, %vm1322_vm8 }
0x1108   :  { %v1318_v51 = vsub.f32 1.0, %v1317_v49 }
0x110a   :  { %v1319_v50 = vmul.f32 %v1837_v48, %v1318_v51  ;;  %v1506_v51 = vld [vmem:[%s2601_s15 + $0x18] sm:$0xff] }
0x110b   :  { %1529 = vmatpush.msra.mxu1 %v1506_v51 }
0x110c   :  { %v1320_v53 = vadd.f32 %v1837_v48, %v1319_v50  ;;  %v1505_v50 = vld [vmem:[%s2601_s15 + $0x10] sm:$0xff] }
0x110d   :  { %1530 = vmatpush.msra.mxu1 %v1505_v50 }
0x110e   :  { %v1324_v34 = vsel %vm1323_vm10, %v1837_v48, %v1320_v53  ;;  %v1504_v53 = vld [vmem:[%s2601_s15 + $0x8] sm:$0xff] }
0x110f   :  { %v1329_v9 = vsel %vm1326_vm12, %v1328_v3, %v1324_v34  ;;  %1531 = vmatpush.msra.mxu1 %v1504_v53  ;;  %vm1658_vm12 = vcmask 0  }
0x1110   :  { %v1341_v19 = vsub.f32 1.0, %v1329_v9  ;;  %v1349_v21 = vmul.f32 %v1347_v1, %v1329_v9 }
0x1111   :  { %1532 = vmatpush.msra.mxu1 %v1503_v62 }
0x1129   :  { %v1271_v46 = vpop.permute.xlu0 %1270 }
0x112a   :  { %v1273_v47 = vmul.f32 %v1271_v46, %v1267_v45 }
0x112c   :  { %1275 = vrot.lane.b32.xlu2 %v1273_v47, %s1974_s28 }
0x1156   :  { %v1332_v40 = vpop.permute.xlu1 %1331 }
0x1157   :  { %v1334_v11 = vmul.f32 %v1332_v40, %v1329_v9  ;;  %v1750_v40 = vld [vmem:[#allocation5] ss:$0 sm:$0xff] }
0x1159   :  { %1336 = vrot.lane.b32.xlu0 %v1334_v11, %s1974_s28 }
0x1186   :  { %v1276_v14 = vpop.permute.xlu2 %1275 }
0x1187   :  { %v1278_v6 = vadd.f32 %v1276_v14, %v1222_v27 }
0x1189   :  { %1838 = vtanh.f32 %v1278_v6 }
0x118f   :  { %v1839_v16 = vpop.eup %1838 }
0x1190   :  { %1282 = vrot.lane.b32.xlu1 %v1839_v16, %s1975_s7 }
0x11cb   :  { %v1337_v7 = vpop.permute.xlu0 %1336 }
0x11cc   :  { %v1339_v17 = vadd.f32 %v1337_v7, %v2373_v33  ;;  %v1447_v7 = vrot.slane %v2452_v58, 6  ;;  %v1601_v58 = vld [vmem:[%s2612_s1] sm:$0xff] }
0x11ce   :  { %1840 = vtanh.f32 %v1339_v17 }
0x11d4   :  { %v1841_v15 = vpop.eup %1840 }
0x11d5   :  { %1343 = vrot.lane.b32.xlu2 %v1841_v15, %s1975_s7 }
0x1202   :  { %v1283_v57 = vpop.permute.xlu1 %1282 }
0x1203   :  { %v1285_v54 = vmul.f32 %v1283_v57, %v1280_v0 }
0x1205   :  { %v2485_v61 = vadd.f32 %v1286_v60, %v1285_v54  ;;  %v1457_v54 = vsel %vm128_vm4, %v2427_v8, %v1447_v7 }
0x1207   :  { %1378 = vrot.lane.b32.xlu0 %v2485_v61, %s1975_s7  ;;  %v1449_v0 = vrot.slane %v2485_v61, 4 }
0x1209   :  { %v1458_v1 = vsel %vm130_vm0, %v1457_v54, %v1449_v0 }
0x122f   :  { %v1344_v20 = vpop.permute.xlu2 %1343 }
0x1230   :  { %v1346_v33 = vmul.f32 %v1344_v20, %v1341_v19  ;;  %v1751_v20 = vld [vmem:[#allocation7] ss:$0 sm:$0xff] }
0x1232   :  { %v1350_v24 = vadd.f32 %v1349_v21, %v1346_v33 }
0x1234   :  { %v1352_v59 = vrot.slane %v1350_v24, 6 }
0x1236   :  { %1353 = vrot.lane.b32.xlu1 %v1352_v59, %s1975_s7 }
0x1279   :  { %v1379_v25 = vpop.permute.xlu0 %1378 }
0x127a   :  { %1725 = vmatmul.msk.f32.vlgmr.msrb.gmra.mxu3 %vm221_vm11, %v1379_v25 }
0x12a8   :  { %v1354_v2 = vpop.permute.xlu1 %1353 }
0x12a9   :  { %1724 = vmatmul.msk.f32.vlgmr.msrb.gmra.mxu2 %vm221_vm11, %v1354_v2 }
0x12fd   :  { %v1399_v4 = vpop.f32.mrf.mxu3 }
0x12fe   :  { %v1400_v27 = vadd.f32 %v2466_v56, %v1399_v4 }
0x1300   :  { %1423 = vrot.lane.b32.xlu2 %v1400_v27, %s1974_s28 }
0x1308   :  { %1470 = vrot.lane.b32.xlu2 %v1456_v35, %s1975_s7 }
0x132c   :  { %v1374_v36 = vpop.f32.mrf.mxu2 }
0x132d   :  { %v1375_v56 = vadd.f32 %v2475_v26, %v1374_v36  ;;  %v1460_v26 = vld [vmem:[%s2599_s13] sm:$0xff] }
0x132e   :  { %1493 = vmatpush.msra.mxu0 %v1460_v26 }
0x132f   :  { %v1402_v22 = vadd.f32 %v1400_v27, %v1375_v56 }
0x1331   :  { %v1726_v30 = vmul.f32 -1.442695, %v1402_v22 }
0x1333   :  { %1842 = vpow2.f32 %v1726_v30 }
0x1339   :  { %v1843_v37 = vpop.eup %1842 }
0x133a   :  { %v1406_v29 = vadd.f32 1.0, %v1843_v37 }
0x133c   :  { %1844 = vrcp.f32 %v1406_v29  ;;  %v1418_v44 = vand.u32 2147483648, %v1406_v29  ;;  %vm1412_vm14 = vweird.f32 %v1406_v29  ;;  %v1416_v45 = vand.u32 2147483647, %v1406_v29 }
0x133e   :  { %v1419_v47 = vor.u32 1.1754944e-38, %v1418_v44  ;;  %vm1417_vm2 = vcmp.eq.f32.partialorder %v1416_v45, 8.507059e+37 }
0x1342   :  { %v1845_v38 = vpop.eup %1844 }
0x1343   :  { %v1408_v39 = vmul.f32 %v1845_v38, %v1406_v29  ;;  %vm1413_vm13 = vweird.f32 %v1845_v38 }
0x1344   :  { %vm1414_vm15 = vmor %vm1412_vm14, %vm1413_vm13 }
0x1345   :  { %v1409_v41 = vsub.f32 1.0, %v1408_v39 }
0x1347   :  { %v1410_v42 = vmul.f32 %v1845_v38, %v1409_v41 }
0x1349   :  { %v1411_v43 = vadd.f32 %v1845_v38, %v1410_v42 }
0x134b   :  { %v1415_v46 = vsel %vm1414_vm15, %v1845_v38, %v1411_v43 }
0x134c   :  { %v1420_v12 = vsel %vm1417_vm2, %v1419_v47, %v1415_v46 }
0x134d   :  { %v1433_v6 = vsub.f32 1.0, %v1420_v12  ;;  %v1439_v17 = vmul.f32 %v1420_v12, %v2485_v61  ;;  %v1602_v61 = vld [vmem:[%s2612_s1 + $0x8] sm:$0xff] }
0x135a   :  { %v1424_v32 = vpop.permute.xlu2 %1423 }
0x135b   :  { %v1426_v48 = vmul.f32 %v1424_v32, %v1420_v12 }
0x135d   :  { %1428 = vrot.lane.b32.xlu0 %v1426_v48, %s1974_s28 }
0x1362   :  { %v1471_v49 = vpop.permute.xlu2 %1470 }
0x1363   :  { %1727 = vmatmul.msk.f32.vlgmr.msra.gmra.mxu0 %vm221_vm11, %v1471_v49 }
0x13cf   :  { %v1429_v63 = vpop.permute.xlu0 %1428 }
0x13d0   :  { %v1431_v34 = vadd.f32 %v1429_v63, %v1375_v56 }
0x13d2   :  { %1846 = vtanh.f32 %v1431_v34 }
0x13d8   :  { %v1847_v3 = vpop.eup %1846 }
0x13d9   :  { %1435 = vrot.lane.b32.xlu1 %v1847_v3, %s1975_s7 }
0x13e0   :  { %v1495_v9 = vpop.f32.mrf.mxu0 }
0x13e1   :  { %v1496_v11 = vadd.f32 %v1750_v40, %v1495_v9  ;;  %v1621_v9 = vld [vmem:[%s2613_s8] sm:$0xff] }
0x13e3   :  { %v1501_v14 = vmax.f32 %v1496_v11, 0.0 }
0x13e5   :  { %1729 = vmatmul.msk.f32.vlgmr.msra.gmra.mxu1 %vm221_vm11, %v1501_v14 }
0x144b   :  { %v1436_v16 = vpop.permute.xlu1 %1435 }
0x144c   :  { %v1438_v15 = vmul.f32 %v1436_v16, %v1433_v6 }
0x144e   :  { %v1440_v57 = vadd.f32 %v1439_v17, %v1438_v15 }
0x1450   :  { %v1452_v60 = vrot.slane %v1440_v57, 2 }
0x1452   :  { %v1459_v19 = vsel %vm132_vm5, %v1458_v1, %v1452_v60 }
0x1453   :  { %1472 = vrot.lane.b32.xlu0 %v1459_v19, %s1975_s7 }
0x145b   :  { %1604 = vperm.xlu0 %1745, %v1601_v58  }
0x1462   :  { %v1534_v21 = vpop.f32.mrf.mxu1 }
0x1463   :  { %v1535_v33 = vadd.f32 %v1751_v20, %v1534_v21  ;;  %1607 = vperm.xlu0 %1745, %v1602_v61  }
0x1465   :  { %v1540_v8 = vsel %vm134_vm1, %v1535_v33, -inf }
0x1466   :  { %1541 = vmax.xlane.f32.xlu1 %v1540_v8 }
0x14c5   :  { %v1473_v24 = vpop.permute.xlu0 %1472 }
0x14c6   :  { %1728 = vmatmul.msk.f32.gmra.mxu0 %vm221_vm11, %v1473_v24 }
0x14cd   :  { %v1605_v31 = vpop.permute.xlu0 %1604 }
0x14ce   :  { %vm1609_vm4 = vcmp.eq.s32.totalorder %v1605_v31, %v2119_v10 }
0x14cf   :  { %v1611_v35 = vsel %vm1609_vm4, %v1535_v33, 0.0 }
0x14d0   :  { %v1613_v36 = vsel %vm134_vm1, %v1611_v35, 0.0 }
0x14d5   :  { %v1608_v37 = vpop.permute.xlu0 %1607 }
0x14d6   :  { %vm1610_vm6 = vcmp.eq.s32.totalorder %v1608_v37, %v2119_v10 }
0x14d9   :  { %v2548_v59 = vpop.xlane.xlu1 %1541 }
0x14da   :  { %vm1546_vm0 = vcmp.eq.f32.partialorder %v1535_v33, %v2548_v59  ;;  %v1583_v25 = vsub.f32 %v1535_v33, %v2548_v59 }
0x14db   :  { %v1548_v2 = vsel %vm1546_vm0, %v2119_v10, 12 }
0x14dc   :  { %v1585_v4 = vmul.f32 1.442695, %v1583_v25  ;;  %v1550_v27 = vsel %vm134_vm1, %v1548_v2, 2147483647 }
0x14dd   :  { %v1552_v55 = vshra.s32 %v1550_v27, 16  ;;  %v1551_v29 = vand.u32 65535, %v1550_v27 }
0x14de   :  { %1848 = vpow2.f32 %v1585_v4 }
0x14df   :  { %v1554_v28 = vcvt.s32.f32 %v1552_v55  ;;  %v1553_v18 = vcvt.s32.f32 %v1551_v29 }
0x14e1   :  { %1555 = vmin.xlane.f32.xlu0 %v1554_v28 }
0x14e4   :  { %v1849_v13 = vpop.eup %1848 }
0x14e5   :  { %v1589_v23 = vsel %vm134_vm1, %v1849_v13, 0.0 }
0x14e6   :  { %1590 = vadd.xlane.f32.xlu1 %v1589_v23 }
0x14ee   :  { %1614 = vadd.xlane.f32.xlu1 %v1613_v36 }
0x1543   :  { %v1498_v56 = vpop.f32.mrf.mxu0 }
0x1544   :  { %v1499_v22 = vadd.f32 %v1750_v40, %v1498_v56  ;;  %v1622_v40 = vld [vmem:[%s2613_s8 + $0x8] sm:$0xff] }
0x1546   :  { %v1502_v30 = vmax.f32 %v1499_v22, 0.0 }
0x1548   :  { %1730 = vmatmul.msk.f32.gmra.mxu1 %vm221_vm11, %v1502_v30  ;;  %vm1580_vm11 = vcmask 7168  }
0x1549   :  { %v1634_v11 = vsel %vm1580_vm11, %v1621_v9, 0.0  ;;  %v1635_v14 = vsel %vm1580_vm11, %v1622_v40, 0.0 }
0x154a   :  { %v1636_v6 = vadd.f32 %v1635_v14, %v1634_v11 }
0x154c   :  { %v1637_v16 = vrot.slane %v1636_v6, 4 }
0x154e   :  { %v1638_v7 = vadd.f32 %v1637_v16, %v1636_v6 }
0x1554   :  { %v1556_v52 = vpop.xlane.xlu0 %1555 }
0x1555   :  { %vm1557_vm5 = vcmp.eq.f32.partialorder %v1554_v28, %v1556_v52  ;;  %v1562_v42 = vcvt.f32.s32 %v1556_v52 }
0x1556   :  { %v1558_v5 = vsel %vm1557_vm5, %v1553_v18, inf }
0x1557   :  { %1559 = vmin.xlane.f32.xlu1 %v1558_v5  ;;  %v1563_v45 = vshll.u32 %v1562_v42, 16 }
0x1559   :  { %v1591_v26 = vpop.xlane.xlu1 %1590 }
0x1561   :  { %v1615_v38 = vpop.xlane.xlu1 %1614 }
0x15c5   :  { %v1537_v39 = vpop.f32.mrf.mxu1 }
0x15c6   :  { %v1538_v41 = vadd.f32 %v1751_v20, %v1537_v39 }
0x15c8   :  { %v1543_v43 = vsel %vm134_vm1, %v1538_v41, -inf  ;;  %v1612_v34 = vsel %vm1610_vm6, %v1538_v41, 0.0 }
0x15c9   :  { %1544 = vmax.xlane.f32.xlu2 %v1543_v43  ;;  %v1616_v3 = vsel %vm134_vm1, %v1612_v34, 0.0 }
0x15ca   :  { %v1560_v44 = vpop.xlane.xlu1 %1559 }
0x15cb   :  { %v1561_v46 = vcvt.f32.s32 %v1560_v44 }
0x15cd   :  { %v1564_v47 = vadd.s32 %v1563_v45, %v1561_v46 }
0x15cf   :  { %1581 = vst.msk [vmem:[%s2603_s17] sm:$0xff] %vm1580_vm11, %v1564_v47 }
0x163c   :  { %v1545_v32 = vpop.xlane.xlu2 %1544 }
0x163d   :  { %vm1547_vm3 = vcmp.eq.f32.partialorder %v1538_v41, %v1545_v32  ;;  %v1584_v12 = vsub.f32 %v1538_v41, %v1545_v32 }
0x163e   :  { %v1549_v48 = vsel %vm1547_vm3, %v2119_v10, 12  ;;  %v1639_v10 = vrot.slane %v1638_v7, 2 }
0x163f   :  { %v1587_v49 = vmul.f32 1.442695, %v1584_v12  ;;  %v1565_v51 = vsel %vm134_vm1, %v1549_v48, 2147483647 }
0x1640   :  { %v1567_v50 = vshra.s32 %v1565_v51, 16  ;;  %v1566_v17 = vand.u32 65535, %v1565_v51  ;;  %v1640_v15 = vadd.f32 %v1639_v10, %v1638_v7 }
0x1641   :  { %1850 = vpow2.f32 %v1587_v49 }
0x1642   :  { %v1569_v53 = vcvt.s32.f32 %v1567_v50  ;;  %1852 = vlog2.f32 %v1591_v26  ;;  %v1568_v57 = vcvt.s32.f32 %v1566_v17  ;;  %v1641_v60 = vrot.slane %v1640_v15, 1 }
0x1644   :  { %1570 = vmin.xlane.f32.xlu2 %v1569_v53  ;;  %v1642_v1 = vadd.f32 %v1641_v60, %v1640_v15 }
0x1646   :  { %1854 = vrcp.f32 %v1642_v1  ;;  %vm1648_vm7 = vweird.f32 %v1642_v1  ;;  %v1652_v37 = vand.u32 2147483647, %v1642_v1 }
0x1647   :  { %v1851_v62 = vpop.eup %1850 }
0x1648   :  { %v1592_v63 = vsel %vm134_vm1, %v1851_v62, 0.0  ;;  %v1853_v19 = vpop.eup %1852  ;;  %vm1653_vm10 = vcmp.eq.f32.partialorder %v1652_v37, 8.507059e+37 }
0x1649   :  { %v1596_v58 = vmul.f32 0.6931472, %v1853_v19 }
0x164b   :  { %v1599_v61 = vadd.f32 %v1596_v58, %v2548_v59  ;;  %v1654_v59 = vand.u32 2147483648, %v1642_v1 }
0x164c   :  { %1593 = vadd.xlane.f32.xlu2 %v1592_v63  ;;  %v1855_v21 = vpop.eup %1854 }
0x164d   :  { %v1619_v8 = vsub.f32 %v1599_v61, %v1615_v38  ;;  %v1644_v25 = vmul.f32 %v1855_v21, %v1642_v1  ;;  %vm1649_vm8 = vweird.f32 %v1855_v21  ;;  %v1655_v52 = vor.u32 1.1754944e-38, %v1654_v59 }
0x164e   :  { %vm1650_vm9 = vmor %vm1648_vm7, %vm1649_vm8 }
0x164f   :  { %v1623_v27 = vmul.f32 %v1621_v9, %v1619_v8  ;;  %v1645_v28 = vsub.f32 1.0, %v1644_v25 }
0x1651   :  { %v1625_v31 = vsel %vm1580_vm11, %v1623_v27, 0.0  ;;  %v1646_v36 = vmul.f32 %v1855_v21, %v1645_v28 }
0x1653   :  { %v1647_v30 = vadd.f32 %v1855_v21, %v1646_v36 }
0x1654   :  { %1617 = vadd.xlane.f32.xlu2 %v1616_v3 }
0x1655   :  { %v1651_v5 = vsel %vm1650_vm9, %v1855_v21, %v1647_v30 }
0x1656   :  { %v1656_v38 = vsel %vm1653_vm10, %v1655_v52, %v1651_v5 }
0x16b7   :  { %v1571_v0 = vpop.xlane.xlu2 %1570 }
0x16b8   :  { %vm1572_vm1 = vcmp.eq.f32.partialorder %v1569_v53, %v1571_v0  ;;  %v1577_v42 = vcvt.f32.s32 %v1571_v0 }
0x16b9   :  { %v1573_v54 = vsel %vm1572_vm1, %v1568_v57, inf }
0x16ba   :  { %1574 = vmin.xlane.f32.xlu2 %v1573_v54  ;;  %v1578_v44 = vshll.u32 %v1577_v42, 16 }
0x16bf   :  { %v1594_v20 = vpop.xlane.xlu2 %1593 }
0x16c0   :  { %1856 = vlog2.f32 %v1594_v20 }
0x16c6   :  { %v1857_v33 = vpop.eup %1856 }
0x16c7   :  { %v1598_v24 = vmul.f32 0.6931472, %v1857_v33  ;;  %v1618_v4 = vpop.xlane.xlu2 %1617 }
0x16c9   :  { %v1600_v2 = vadd.f32 %v1598_v24, %v1545_v32 }
0x16cb   :  { %v1620_v55 = vsub.f32 %v1600_v2, %v1618_v4 }
0x16cd   :  { %v1624_v13 = vmul.f32 %v1622_v40, %v1620_v55 }
0x16cf   :  { %v1626_v23 = vsel %vm1580_vm11, %v1624_v13, 0.0 }
0x16d0   :  { %v1627_v35 = vadd.f32 %v1626_v23, %v1625_v31 }
0x16d2   :  { %v1628_v56 = vrot.slane %v1627_v35, 4 }
0x16d4   :  { %v1629_v22 = vadd.f32 %v1628_v56, %v1627_v35 }
0x16d6   :  { %v1630_v29 = vrot.slane %v1629_v22, 2 }
0x16d8   :  { %v1631_v18 = vadd.f32 %v1630_v29, %v1629_v22 }
0x16da   :  { %v1632_v26 = vrot.slane %v1631_v18, 1 }
0x16dc   :  { %v1633_v39 = vadd.f32 %v1632_v26, %v1631_v18 }
0x16de   :  { %v1657_v41 = vmul.f32 %v1656_v38, %v1633_v39 }
0x16e0   :  { %1659 = vst.msk [vmem:[#allocation8] sm:$0x1] %vm1658_vm12, %v1657_v41 }
0x16e1   :  { %1672 = dma.vmem_to_hbm [thread:$0]  %s1668_s11, 16, %s1670_s14, [#allocation4]  }
0x172d   :  { %v1575_v43 = vpop.xlane.xlu2 %1574 }
0x172e   :  { %v1576_v45 = vcvt.f32.s32 %v1575_v43 }
0x1730   :  { %v1579_v46 = vadd.s32 %v1578_v44, %v1576_v45 }
0x1732   :  { %1582 = vst.msk [vmem:[%s2603_s17 + $0x8] sm:$0xff] %vm1580_vm11, %v1579_v46 }
0x1733   :  { %1965 = dma.done.wait [#allocation4], 16  }
0x1734   :  { %1966 = vsyncadd [#allocation4], 4294967280 }
0x1735   :  { %1679 = vsyncpa [#allocation3], 1 }
0x1736   :  { %1680 = vsyncpa [#allocation6], 1 }
0x1737   :  { %1681 = vsyncpa [#allocation4], 1 }

</bundles_post_ra>
